<compile_context>
chip_gen: v7x
topology: tpu7x:2x2x1
jax: 0.10.0
libtpu: 0.0.40
codegen_flags: <defaults>
</compile_context>

<pallas_src>
import functools

import jax
import jax.numpy as jnp
from jax import lax
from jax.experimental import pallas as pl
from jax.experimental.pallas import tpu as pltpu


def _mxu_dot(x, w):
    return jnp.dot(x, w, precision=lax.Precision.HIGHEST,
                   preferred_element_type=jnp.float32)


def _vpu_small_k(x, w, row_offset=0):
    """(N, K) @ (K, F) with tiny K, as unrolled VPU multiply-adds.

    `w` may be a larger matrix; the K rows starting at `row_offset` are used.
    Keeps the MXU for contractions with K >= 32 only.
    """
    k = x.shape[1]
    acc = x[:, 0:1] * w[row_offset:row_offset + 1, :]
    for t in range(1, k):
        r = row_offset + t
        acc = acc + x[:, t:t + 1] * w[r:r + 1, :]
    return acc


def _make_kernel(rep, n_valid, n_pad, m, e):
    relu = lambda v: jnp.maximum(v, 0.0)

    def kernel(nmap_ref, emb_ref,
               wm1c_ref, wm2c_ref, we1c_ref, we2c_ref, bc_ref,
               wn1_ref, bn1_ref, wn2_ref, bn2_ref,
               wh1_ref, bh1_ref, wh2_ref, bh2_ref,
               emb_out_ref, heads_out_ref):
        nmap = nmap_ref[...]                                     # (Np, M)
        emb = emb_ref[...]                                       # (Np, E)
        wn1 = wn1_ref[...]                                       # (M+2+E, E) node_w1.T
        wn_agg = wn1[m + 2:, :]                                  # (E, E) static slice

        # Loop-invariant contributions (result_map never changes across the 2 rounds).
        a_map = _vpu_small_k(nmap / 10.0, wm1c_ref[...])         # (Np, 2E)  i-part, map
        b_map = _vpu_small_k(nmap, wm2c_ref[...]) + bc_ref[...]  # (Np, 2E)  j-part, map+bias
        rel = nmap[:, :2] - nmap[rep:rep + 1, :2]                # (Np, 2)
        node_const = (_vpu_small_k(nmap, wn1)                    # map columns of node_w1
                      + _vpu_small_k(rel, wn1, row_offset=m)     # rel columns of node_w1
                      + bn1_ref[...])                            # (Np, E)

        for _ in range(2):
            # Fused (edge_processor | edge_attn_processor) nets, 2E = 64 output lanes.
            a_c = a_map + _mxu_dot(emb, we1c_ref[...])           # (Np, 2E)  depends on i
            b_c = b_map + _mxu_dot(emb, we2c_ref[...])           # (Np, 2E)  depends on j
            a_p, a_a = a_c[:, :e], a_c[:, e:]
            b_p, b_a = b_c[:, :e], b_c[:, e:]

            num = jnp.zeros((n_pad, e), jnp.float32)
            den = jnp.zeros((n_pad, e), jnp.float32)
            # Unrolled over neighbours j (Voronoi neighbourhoods are tiny); padded
            # rows are skipped statically so no masking is needed.  All ops stay
            # 2-D sublane/lane aligned.
            for j in range(n_valid):
                proc_j = relu(a_p + b_p[j:j + 1, :])             # (Np, E)
                attn_j = relu(a_a + b_a[j:j + 1, :])
                w_j = 1.0 / (attn_j * attn_j + 0.01)
                num = num + proc_j * w_j
                den = den + w_j

            agg2 = emb + num / den
            h = relu(node_const + _mxu_dot(agg2, wn_agg))
            emb = _mxu_dot(h, wn2_ref[...]) + bn2_ref[...]       # (Np, E)

        emb_out_ref[...] = emb.astype(emb_out_ref.dtype)

        # Fused prediction heads: (Np, E) @ (E, 4E = 128) -> relu -> block-diag (4E, 8).
        h_all = relu(_mxu_dot(emb, wh1_ref[...]) + bh1_ref[...])
        heads = _mxu_dot(h_all, wh2_ref[...]) + bh2_ref[...]     # (Np, 8)
        heads_out_ref[...] = heads.astype(heads_out_ref.dtype)

    return kernel


def _pack_params(p, m, e):
    """Re-layout the PyTorch-style Linear params into kernel-friendly matrices."""
    def split_edge(w):  # w: (E, 2M+2E) columns = [map_i/10 | map_j | emb_i | emb_j]
        return (w[:, :m].T, w[:, m:2 * m].T,
                w[:, 2 * m:2 * m + e].T, w[:, 2 * m + e:].T)

    pm1, pm2, pe1, pe2 = split_edge(p['edge_w'])
    am1, am2, ae1, ae2 = split_edge(p['edge_attn_w'])
    wm1c = jnp.concatenate([pm1, am1], axis=1)                   # (M, 2E)
    wm2c = jnp.concatenate([pm2, am2], axis=1)                   # (M, 2E)
    we1c = jnp.concatenate([pe1, ae1], axis=1)                   # (E, 2E)
    we2c = jnp.concatenate([pe2, ae2], axis=1)                   # (E, 2E)
    bc = jnp.concatenate([p['edge_b'], p['edge_attn_b']])[None, :]   # (1, 2E)

    wn1 = p['node_w1'].T                                         # (M+2+E, E)
    bn1 = p['node_b1'][None, :]
    wn2 = p['node_w2'].T
    bn2 = p['node_b2'][None, :]

    head_w1, head_b1, head_w2, head_b2 = [], [], [], []
    for name in ('position', 'tangent', 'normal'):
        head_w1.append(p[name + '_w1'].T)                        # (E, E)
        head_b1.append(p[name + '_b1'])
        head_w2.append(p[name + '_w2'].T)                        # (E, 2)
        head_b2.append(p[name + '_b2'])
    fw1 = p['future_w1']                                         # (E, E+1)
    head_w1.append(fw1[:, :e].T)
    head_b1.append(p['future_b1'] + fw1[:, e])                   # absorb the constant-1 input
    head_w2.append(p['future_w2'].T)
    head_b2.append(p['future_b2'])

    wh1 = jnp.concatenate(head_w1, axis=1)                       # (E, 4E)
    bh1 = jnp.concatenate(head_b1)[None, :]                      # (1, 4E)
    wh2 = jnp.zeros((4 * e, 8), jnp.float32)                     # block-diagonal 2nd layer
    for k in range(4):
        wh2 = wh2.at[k * e:(k + 1) * e, 2 * k:2 * k + 2].set(head_w2[k])
    bh2 = jnp.concatenate(head_b2)[None, :]                      # (1, 8)

    return (wm1c, wm2c, we1c, we2c, bc,
            wn1, bn1, wn2, bn2,
            wh1, bh1, wh2, bh2)


@functools.partial(jax.jit, static_argnums=(2,))
def local_processing_forward(neighborhood, neighborhood_embedding, representative_id, params):
    """Fused Pallas implementation of LocalProcessing.forward (jit-cached per shape/rep)."""
    n, m = neighborhood.shape
    e = neighborhood_embedding.shape[1]
    rep = int(representative_id)

    n_pad = ((n + 7) // 8) * 8                                   # sublane alignment
    if n_pad != n:
        nmap_p = jnp.pad(neighborhood, ((0, n_pad - n), (0, 0)))
        emb_p = jnp.pad(neighborhood_embedding, ((0, n_pad - n), (0, 0)))
    else:
        nmap_p, emb_p = neighborhood, neighborhood_embedding

    inputs = (nmap_p, emb_p) + _pack_params(params, m, e)
    kernel = _make_kernel(rep=rep, n_valid=n, n_pad=n_pad, m=m, e=e)

    in_specs = [pl.BlockSpec(a.shape, lambda i: (0, 0)) for a in inputs]
    out_specs = (pl.BlockSpec((n_pad, e), lambda i: (0, 0)),
                 pl.BlockSpec((n_pad, 8), lambda i: (0, 0)))
    out_shape = (jax.ShapeDtypeStruct((n_pad, e), jnp.float32),
                 jax.ShapeDtypeStruct((n_pad, 8), jnp.float32))

    emb_out, heads_out = pl.pallas_call(
        kernel,
        out_shape=out_shape,
        grid_spec=pl.GridSpec(grid=(1,), in_specs=in_specs, out_specs=out_specs),
        compiler_params=pltpu.CompilerParams(dimension_semantics=("arbitrary",)),
    )(*inputs)

    heads = heads_out[:n]
    additional_stats = {
        'position': heads[:, 0:2],
        'tangent': heads[:, 2:4],
        'normal': heads[:, 4:6],
        'future_position_1': heads[:, 6:8],
        'future_position_2': heads[:, 6:8],
    }
    # result_map is never updated by the module, so its representative row is the input row.
    return (neighborhood[rep:rep + 1, :],
            emb_out[rep:rep + 1, :],
            additional_stats)


# ----------------------------------------------------------------------------- reference


def _reference_forward(neighborhood, embedding, rep, p):
    """Literal (pure-JAX) transcription of the PyTorch forward, used as a check."""
    relu = lambda v: jnp.maximum(v, 0.0)

    def linear(x, w, b):
        return jnp.dot(x, w.T, precision=lax.Precision.HIGHEST) + b

    n, m = neighborhood.shape
    e = embedding.shape[1]
    result_map = neighborhood
    emb = embedding
    for _ in range(2):
        agg = emb
        map1 = jnp.broadcast_to((result_map / 10.0)[:, None, :], (n, n, m))
        map2 = jnp.broadcast_to(result_map[None, :, :], (n, n, m))
        e1 = jnp.broadcast_to(emb[:, None, :], (n, n, e))
        e2 = jnp.broadcast_to(emb[None, :, :], (n, n, e))
        edge_in = jnp.concatenate([map1, map2, e1, e2], axis=2)
        attn = relu(linear(edge_in, p['edge_attn_w'], p['edge_attn_b']))
        wts = 1.0 / (attn ** 2 + 0.01)
        proc = relu(linear(edge_in, p['edge_w'], p['edge_b']))
        agg2 = agg + (proc * wts).sum(axis=1) / wts.sum(axis=1)
        node_in = jnp.concatenate(
            [result_map, result_map[:, :2] - result_map[rep, :2], agg2], axis=1)
        h = relu(linear(node_in, p['node_w1'], p['node_b1']))
        emb = linear(h, p['node_w2'], p['node_b2'])

    stats = {}
    for name in ('position', 'tangent', 'normal'):
        h = relu(linear(emb, p[name + '_w1'], p[name + '_b1']))
        stats[name] = linear(h, p[name + '_w2'], p[name + '_b2'])
    fut_in = jnp.concatenate([emb, emb[:, :1] * 0 + 1.0], axis=1)
    h = relu(linear(fut_in, p['future_w1'], p['future_b1']))
    fut = linear(h, p['future_w2'], p['future_b2'])
    stats['future_position_1'] = fut
    stats['future_position_2'] = fut
    return result_map[rep:rep + 1, :], emb[rep:rep + 1, :], stats


def init_params(key, map_dim, embed_dim):
    """Deterministic PyTorch-Linear-style parameters (weight = [out, in])."""
    def linear_init(k, out_dim, in_dim):
        kw, kb = jax.random.split(k)
        bound = 1.0 / (in_dim ** 0.5)
        w = jax.random.uniform(kw, (out_dim, in_dim), jnp.float32, -bound, bound)
        b = jax.random.uniform(kb, (out_dim,), jnp.float32, -bound, bound)
        return w, b

    m, e = map_dim, embed_dim
    keys = jax.random.split(key, 12)
    p = {}
    p['node_w1'], p['node_b1'] = linear_init(keys[0], e, m + e + 2)
    p['node_w2'], p['node_b2'] = linear_init(keys[1], e, e)
    p['edge_w'], p['edge_b'] = linear_init(keys[2], e, 2 * m + 2 * e)
    p['edge_attn_w'], p['edge_attn_b'] = linear_init(keys[3], e, 2 * m + 2 * e)
    i = 4
    for name in ('position', 'tangent', 'normal'):
        p[name + '_w1'], p[name + '_b1'] = linear_init(keys[i], e, e)
        p[name + '_w2'], p[name + '_b2'] = linear_init(keys[i + 1], 2, e)
        i += 2
    p['future_w1'], p['future_b1'] = linear_init(keys[10], e, e + 1)
    p['future_w2'], p['future_b2'] = linear_init(keys[11], 2, e)
    return p


if __name__ == "__main__":
    map_dim, embed_dim = 6, 32
    num_nodes, rep_id = 8, 3

    key = jax.random.PRNGKey(0)
    k_map, k_emb, k_par = jax.random.split(key, 3)
    neighborhood = jax.random.normal(k_map, (num_nodes, map_dim), jnp.float32)
    neighborhood_embedding = jax.random.normal(k_emb, (num_nodes, embed_dim), jnp.float32)
    params = init_params(k_par, map_dim, embed_dim)

    rep_map, rep_emb, stats = local_processing_forward(
        neighborhood, neighborhood_embedding, rep_id, params)
    rep_emb = jax.block_until_ready(rep_emb)

    ref_map, ref_emb, ref_stats = _reference_forward(
        neighborhood, neighborhood_embedding, rep_id, params)

    assert rep_map.shape == (1, map_dim)
    assert rep_emb.shape == (1, embed_dim)
    assert jnp.allclose(rep_map, ref_map)
    assert jnp.allclose(rep_emb, ref_emb, atol=1e-3, rtol=1e-3), \
        float(jnp.max(jnp.abs(rep_emb - ref_emb)))
    for name in ('position', 'tangent', 'normal', 'future_position_1', 'future_position_2'):
        assert stats[name].shape == (num_nodes, 2)
        assert jnp.allclose(stats[name], ref_stats[name], atol=1e-3, rtol=1e-3), name

    print("KERNEL_OK")
</pallas_src>

<mosaic_0001>
module attributes {stable_mosaic.version = 11 : i64} {
  func.func @kernel(%arg0: i32, %arg1: memref<8x6xf32, #tpu.memory_space<vmem>>, %arg2: memref<8x32xf32, #tpu.memory_space<vmem>>, %arg3: memref<6x64xf32, #tpu.memory_space<vmem>>, %arg4: memref<6x64xf32, #tpu.memory_space<vmem>>, %arg5: memref<32x64xf32, #tpu.memory_space<vmem>>, %arg6: memref<32x64xf32, #tpu.memory_space<vmem>>, %arg7: memref<1x64xf32, #tpu.memory_space<vmem>>, %arg8: memref<40x32xf32, #tpu.memory_space<vmem>>, %arg9: memref<1x32xf32, #tpu.memory_space<vmem>>, %arg10: memref<32x32xf32, #tpu.memory_space<vmem>>, %arg11: memref<1x32xf32, #tpu.memory_space<vmem>>, %arg12: memref<32x128xf32, #tpu.memory_space<vmem>>, %arg13: memref<1x128xf32, #tpu.memory_space<vmem>>, %arg14: memref<128x8xf32, #tpu.memory_space<vmem>>, %arg15: memref<1x8xf32, #tpu.memory_space<vmem>>, %arg16: memref<8x32xf32, #tpu.memory_space<vmem>>, %arg17: memref<8x8xf32, #tpu.memory_space<vmem>>) attributes {dimension_semantics = [#tpu.dimension_semantics<arbitrary>], iteration_bounds = array<i64: 1>, scalar_prefetch = 0 : i64, scratch_operands = 0 : i64, tpu.core_type = #tpu.core_type<tc>, window_params = [{pipeline_mode = #tpu.pipeline_mode<synchronous>, transform_indices = @transform_0, window_bounds = array<i64: 8, 6>}, {pipeline_mode = #tpu.pipeline_mode<synchronous>, transform_indices = @transform_1, window_bounds = array<i64: 8, 32>}, {pipeline_mode = #tpu.pipeline_mode<synchronous>, transform_indices = @transform_2, window_bounds = array<i64: 6, 64>}, {pipeline_mode = #tpu.pipeline_mode<synchronous>, transform_indices = @transform_3, window_bounds = array<i64: 6, 64>}, {pipeline_mode = #tpu.pipeline_mode<synchronous>, transform_indices = @transform_4, window_bounds = array<i64: 32, 64>}, {pipeline_mode = #tpu.pipeline_mode<synchronous>, transform_indices = @transform_5, window_bounds = array<i64: 32, 64>}, {pipeline_mode = #tpu.pipeline_mode<synchronous>, transform_indices = @transform_6, window_bounds = array<i64: 1, 64>}, {pipeline_mode = #tpu.pipeline_mode<synchronous>, transform_indices = @transform_7, window_bounds = array<i64: 40, 32>}, {pipeline_mode = #tpu.pipeline_mode<synchronous>, transform_indices = @transform_8, window_bounds = array<i64: 1, 32>}, {pipeline_mode = #tpu.pipeline_mode<synchronous>, transform_indices = @transform_9, window_bounds = array<i64: 32, 32>}, {pipeline_mode = #tpu.pipeline_mode<synchronous>, transform_indices = @transform_10, window_bounds = array<i64: 1, 32>}, {pipeline_mode = #tpu.pipeline_mode<synchronous>, transform_indices = @transform_11, window_bounds = array<i64: 32, 128>}, {pipeline_mode = #tpu.pipeline_mode<synchronous>, transform_indices = @transform_12, window_bounds = array<i64: 1, 128>}, {pipeline_mode = #tpu.pipeline_mode<synchronous>, transform_indices = @transform_13, window_bounds = array<i64: 128, 8>}, {pipeline_mode = #tpu.pipeline_mode<synchronous>, transform_indices = @transform_14, window_bounds = array<i64: 1, 8>}, {pipeline_mode = #tpu.pipeline_mode<synchronous>, transform_indices = @transform_15, window_bounds = array<i64: 8, 32>}, {pipeline_mode = #tpu.pipeline_mode<synchronous>, transform_indices = @transform_16, window_bounds = array<i64: 8, 8>}]} {
    %c0 = arith.constant 0 : index
    %c0_0 = arith.constant 0 : index
    %0 = vector.load %arg1[%c0, %c0_0] : memref<8x6xf32, #tpu.memory_space<vmem>>, vector<8x6xf32>
    %c0_1 = arith.constant 0 : index
    %c0_2 = arith.constant 0 : index
    %1 = vector.load %arg2[%c0_1, %c0_2] : memref<8x32xf32, #tpu.memory_space<vmem>>, vector<8x32xf32>
    %c0_3 = arith.constant 0 : index
    %c0_4 = arith.constant 0 : index
    %2 = vector.load %arg8[%c0_3, %c0_4] : memref<40x32xf32, #tpu.memory_space<vmem>>, vector<40x32xf32>
    %3 = vector.extract_strided_slice %2 {offsets = [8, 0], sizes = [32, 32], strides = [1, 1]} : vector<40x32xf32> to vector<32x32xf32>
    %cst = arith.constant 1.000000e+01 : f32
    %4 = vector.broadcast %cst : f32 to vector<8x6xf32>
    %5 = arith.divf %0, %4 : vector<8x6xf32>
    %c0_5 = arith.constant 0 : index
    %c0_6 = arith.constant 0 : index
    %6 = vector.load %arg3[%c0_5, %c0_6] : memref<6x64xf32, #tpu.memory_space<vmem>>, vector<6x64xf32>
    %7 = vector.extract_strided_slice %5 {offsets = [0, 0], sizes = [8, 1], strides = [1, 1]} : vector<8x6xf32> to vector<8x1xf32>
    %8 = vector.extract_strided_slice %6 {offsets = [0, 0], sizes = [1, 64], strides = [1, 1]} : vector<6x64xf32> to vector<1x64xf32>
    %9 = vector.broadcast %7 : vector<8x1xf32> to vector<8x64xf32>
    %10 = vector.broadcast %8 : vector<1x64xf32> to vector<8x64xf32>
    %11 = arith.mulf %9, %10 : vector<8x64xf32>
    %12 = vector.extract_strided_slice %5 {offsets = [0, 1], sizes = [8, 1], strides = [1, 1]} : vector<8x6xf32> to vector<8x1xf32>
    %13 = vector.extract_strided_slice %6 {offsets = [1, 0], sizes = [1, 64], strides = [1, 1]} : vector<6x64xf32> to vector<1x64xf32>
    %14 = vector.broadcast %12 : vector<8x1xf32> to vector<8x64xf32>
    %15 = vector.broadcast %13 : vector<1x64xf32> to vector<8x64xf32>
    %16 = arith.mulf %14, %15 : vector<8x64xf32>
    %17 = arith.addf %11, %16 : vector<8x64xf32>
    %18 = vector.extract_strided_slice %5 {offsets = [0, 2], sizes = [8, 1], strides = [1, 1]} : vector<8x6xf32> to vector<8x1xf32>
    %19 = vector.extract_strided_slice %6 {offsets = [2, 0], sizes = [1, 64], strides = [1, 1]} : vector<6x64xf32> to vector<1x64xf32>
    %20 = vector.broadcast %18 : vector<8x1xf32> to vector<8x64xf32>
    %21 = vector.broadcast %19 : vector<1x64xf32> to vector<8x64xf32>
    %22 = arith.mulf %20, %21 : vector<8x64xf32>
    %23 = arith.addf %17, %22 : vector<8x64xf32>
    %24 = vector.extract_strided_slice %5 {offsets = [0, 3], sizes = [8, 1], strides = [1, 1]} : vector<8x6xf32> to vector<8x1xf32>
    %25 = vector.extract_strided_slice %6 {offsets = [3, 0], sizes = [1, 64], strides = [1, 1]} : vector<6x64xf32> to vector<1x64xf32>
    %26 = vector.broadcast %24 : vector<8x1xf32> to vector<8x64xf32>
    %27 = vector.broadcast %25 : vector<1x64xf32> to vector<8x64xf32>
    %28 = arith.mulf %26, %27 : vector<8x64xf32>
    %29 = arith.addf %23, %28 : vector<8x64xf32>
    %30 = vector.extract_strided_slice %5 {offsets = [0, 4], sizes = [8, 1], strides = [1, 1]} : vector<8x6xf32> to vector<8x1xf32>
    %31 = vector.extract_strided_slice %6 {offsets = [4, 0], sizes = [1, 64], strides = [1, 1]} : vector<6x64xf32> to vector<1x64xf32>
    %32 = vector.broadcast %30 : vector<8x1xf32> to vector<8x64xf32>
    %33 = vector.broadcast %31 : vector<1x64xf32> to vector<8x64xf32>
    %34 = arith.mulf %32, %33 : vector<8x64xf32>
    %35 = arith.addf %29, %34 : vector<8x64xf32>
    %36 = vector.extract_strided_slice %5 {offsets = [0, 5], sizes = [8, 1], strides = [1, 1]} : vector<8x6xf32> to vector<8x1xf32>
    %37 = vector.extract_strided_slice %6 {offsets = [5, 0], sizes = [1, 64], strides = [1, 1]} : vector<6x64xf32> to vector<1x64xf32>
    %38 = vector.broadcast %36 : vector<8x1xf32> to vector<8x64xf32>
    %39 = vector.broadcast %37 : vector<1x64xf32> to vector<8x64xf32>
    %40 = arith.mulf %38, %39 : vector<8x64xf32>
    %41 = arith.addf %35, %40 : vector<8x64xf32>
    %c0_7 = arith.constant 0 : index
    %c0_8 = arith.constant 0 : index
    %42 = vector.load %arg4[%c0_7, %c0_8] : memref<6x64xf32, #tpu.memory_space<vmem>>, vector<6x64xf32>
    %43 = vector.extract_strided_slice %0 {offsets = [0, 0], sizes = [8, 1], strides = [1, 1]} : vector<8x6xf32> to vector<8x1xf32>
    %44 = vector.extract_strided_slice %42 {offsets = [0, 0], sizes = [1, 64], strides = [1, 1]} : vector<6x64xf32> to vector<1x64xf32>
    %45 = vector.broadcast %43 : vector<8x1xf32> to vector<8x64xf32>
    %46 = vector.broadcast %44 : vector<1x64xf32> to vector<8x64xf32>
    %47 = arith.mulf %45, %46 : vector<8x64xf32>
    %48 = vector.extract_strided_slice %0 {offsets = [0, 1], sizes = [8, 1], strides = [1, 1]} : vector<8x6xf32> to vector<8x1xf32>
    %49 = vector.extract_strided_slice %42 {offsets = [1, 0], sizes = [1, 64], strides = [1, 1]} : vector<6x64xf32> to vector<1x64xf32>
    %50 = vector.broadcast %48 : vector<8x1xf32> to vector<8x64xf32>
    %51 = vector.broadcast %49 : vector<1x64xf32> to vector<8x64xf32>
    %52 = arith.mulf %50, %51 : vector<8x64xf32>
    %53 = arith.addf %47, %52 : vector<8x64xf32>
    %54 = vector.extract_strided_slice %0 {offsets = [0, 2], sizes = [8, 1], strides = [1, 1]} : vector<8x6xf32> to vector<8x1xf32>
    %55 = vector.extract_strided_slice %42 {offsets = [2, 0], sizes = [1, 64], strides = [1, 1]} : vector<6x64xf32> to vector<1x64xf32>
    %56 = vector.broadcast %54 : vector<8x1xf32> to vector<8x64xf32>
    %57 = vector.broadcast %55 : vector<1x64xf32> to vector<8x64xf32>
    %58 = arith.mulf %56, %57 : vector<8x64xf32>
    %59 = arith.addf %53, %58 : vector<8x64xf32>
    %60 = vector.extract_strided_slice %0 {offsets = [0, 3], sizes = [8, 1], strides = [1, 1]} : vector<8x6xf32> to vector<8x1xf32>
    %61 = vector.extract_strided_slice %42 {offsets = [3, 0], sizes = [1, 64], strides = [1, 1]} : vector<6x64xf32> to vector<1x64xf32>
    %62 = vector.broadcast %60 : vector<8x1xf32> to vector<8x64xf32>
    %63 = vector.broadcast %61 : vector<1x64xf32> to vector<8x64xf32>
    %64 = arith.mulf %62, %63 : vector<8x64xf32>
    %65 = arith.addf %59, %64 : vector<8x64xf32>
    %66 = vector.extract_strided_slice %0 {offsets = [0, 4], sizes = [8, 1], strides = [1, 1]} : vector<8x6xf32> to vector<8x1xf32>
    %67 = vector.extract_strided_slice %42 {offsets = [4, 0], sizes = [1, 64], strides = [1, 1]} : vector<6x64xf32> to vector<1x64xf32>
    %68 = vector.broadcast %66 : vector<8x1xf32> to vector<8x64xf32>
    %69 = vector.broadcast %67 : vector<1x64xf32> to vector<8x64xf32>
    %70 = arith.mulf %68, %69 : vector<8x64xf32>
    %71 = arith.addf %65, %70 : vector<8x64xf32>
    %72 = vector.extract_strided_slice %0 {offsets = [0, 5], sizes = [8, 1], strides = [1, 1]} : vector<8x6xf32> to vector<8x1xf32>
    %73 = vector.extract_strided_slice %42 {offsets = [5, 0], sizes = [1, 64], strides = [1, 1]} : vector<6x64xf32> to vector<1x64xf32>
    %74 = vector.broadcast %72 : vector<8x1xf32> to vector<8x64xf32>
    %75 = vector.broadcast %73 : vector<1x64xf32> to vector<8x64xf32>
    %76 = arith.mulf %74, %75 : vector<8x64xf32>
    %77 = arith.addf %71, %76 : vector<8x64xf32>
    %c0_9 = arith.constant 0 : index
    %c0_10 = arith.constant 0 : index
    %78 = vector.load %arg7[%c0_9, %c0_10] : memref<1x64xf32, #tpu.memory_space<vmem>>, vector<1x64xf32>
    %79 = vector.broadcast %78 : vector<1x64xf32> to vector<8x64xf32>
    %80 = arith.addf %77, %79 : vector<8x64xf32>
    %81 = vector.extract_strided_slice %0 {offsets = [0, 0], sizes = [8, 2], strides = [1, 1]} : vector<8x6xf32> to vector<8x2xf32>
    %82 = vector.extract_strided_slice %0 {offsets = [3, 0], sizes = [1, 2], strides = [1, 1]} : vector<8x6xf32> to vector<1x2xf32>
    %83 = vector.broadcast %82 : vector<1x2xf32> to vector<8x2xf32>
    %84 = arith.subf %81, %83 : vector<8x2xf32>
    %85 = vector.extract_strided_slice %0 {offsets = [0, 0], sizes = [8, 1], strides = [1, 1]} : vector<8x6xf32> to vector<8x1xf32>
    %86 = vector.extract_strided_slice %2 {offsets = [0, 0], sizes = [1, 32], strides = [1, 1]} : vector<40x32xf32> to vector<1x32xf32>
    %87 = vector.broadcast %85 : vector<8x1xf32> to vector<8x32xf32>
    %88 = vector.broadcast %86 : vector<1x32xf32> to vector<8x32xf32>
    %89 = arith.mulf %87, %88 : vector<8x32xf32>
    %90 = vector.extract_strided_slice %0 {offsets = [0, 1], sizes = [8, 1], strides = [1, 1]} : vector<8x6xf32> to vector<8x1xf32>
    %91 = vector.extract_strided_slice %2 {offsets = [1, 0], sizes = [1, 32], strides = [1, 1]} : vector<40x32xf32> to vector<1x32xf32>
    %92 = vector.broadcast %90 : vector<8x1xf32> to vector<8x32xf32>
    %93 = vector.broadcast %91 : vector<1x32xf32> to vector<8x32xf32>
    %94 = arith.mulf %92, %93 : vector<8x32xf32>
    %95 = arith.addf %89, %94 : vector<8x32xf32>
    %96 = vector.extract_strided_slice %0 {offsets = [0, 2], sizes = [8, 1], strides = [1, 1]} : vector<8x6xf32> to vector<8x1xf32>
    %97 = vector.extract_strided_slice %2 {offsets = [2, 0], sizes = [1, 32], strides = [1, 1]} : vector<40x32xf32> to vector<1x32xf32>
    %98 = vector.broadcast %96 : vector<8x1xf32> to vector<8x32xf32>
    %99 = vector.broadcast %97 : vector<1x32xf32> to vector<8x32xf32>
    %100 = arith.mulf %98, %99 : vector<8x32xf32>
    %101 = arith.addf %95, %100 : vector<8x32xf32>
    %102 = vector.extract_strided_slice %0 {offsets = [0, 3], sizes = [8, 1], strides = [1, 1]} : vector<8x6xf32> to vector<8x1xf32>
    %103 = vector.extract_strided_slice %2 {offsets = [3, 0], sizes = [1, 32], strides = [1, 1]} : vector<40x32xf32> to vector<1x32xf32>
    %104 = vector.broadcast %102 : vector<8x1xf32> to vector<8x32xf32>
    %105 = vector.broadcast %103 : vector<1x32xf32> to vector<8x32xf32>
    %106 = arith.mulf %104, %105 : vector<8x32xf32>
    %107 = arith.addf %101, %106 : vector<8x32xf32>
    %108 = vector.extract_strided_slice %0 {offsets = [0, 4], sizes = [8, 1], strides = [1, 1]} : vector<8x6xf32> to vector<8x1xf32>
    %109 = vector.extract_strided_slice %2 {offsets = [4, 0], sizes = [1, 32], strides = [1, 1]} : vector<40x32xf32> to vector<1x32xf32>
    %110 = vector.broadcast %108 : vector<8x1xf32> to vector<8x32xf32>
    %111 = vector.broadcast %109 : vector<1x32xf32> to vector<8x32xf32>
    %112 = arith.mulf %110, %111 : vector<8x32xf32>
    %113 = arith.addf %107, %112 : vector<8x32xf32>
    %114 = vector.extract_strided_slice %0 {offsets = [0, 5], sizes = [8, 1], strides = [1, 1]} : vector<8x6xf32> to vector<8x1xf32>
    %115 = vector.extract_strided_slice %2 {offsets = [5, 0], sizes = [1, 32], strides = [1, 1]} : vector<40x32xf32> to vector<1x32xf32>
    %116 = vector.broadcast %114 : vector<8x1xf32> to vector<8x32xf32>
    %117 = vector.broadcast %115 : vector<1x32xf32> to vector<8x32xf32>
    %118 = arith.mulf %116, %117 : vector<8x32xf32>
    %119 = arith.addf %113, %118 : vector<8x32xf32>
    %120 = vector.extract_strided_slice %84 {offsets = [0, 0], sizes = [8, 1], strides = [1, 1]} : vector<8x2xf32> to vector<8x1xf32>
    %121 = vector.extract_strided_slice %2 {offsets = [6, 0], sizes = [1, 32], strides = [1, 1]} : vector<40x32xf32> to vector<1x32xf32>
    %122 = vector.broadcast %120 : vector<8x1xf32> to vector<8x32xf32>
    %123 = vector.broadcast %121 : vector<1x32xf32> to vector<8x32xf32>
    %124 = arith.mulf %122, %123 : vector<8x32xf32>
    %125 = vector.extract_strided_slice %84 {offsets = [0, 1], sizes = [8, 1], strides = [1, 1]} : vector<8x2xf32> to vector<8x1xf32>
    %126 = vector.extract_strided_slice %2 {offsets = [7, 0], sizes = [1, 32], strides = [1, 1]} : vector<40x32xf32> to vector<1x32xf32>
    %127 = vector.broadcast %125 : vector<8x1xf32> to vector<8x32xf32>
    %128 = vector.broadcast %126 : vector<1x32xf32> to vector<8x32xf32>
    %129 = arith.mulf %127, %128 : vector<8x32xf32>
    %130 = arith.addf %124, %129 : vector<8x32xf32>
    %131 = arith.addf %119, %130 : vector<8x32xf32>
    %c0_11 = arith.constant 0 : index
    %c0_12 = arith.constant 0 : index
    %132 = vector.load %arg9[%c0_11, %c0_12] : memref<1x32xf32, #tpu.memory_space<vmem>>, vector<1x32xf32>
    %133 = vector.broadcast %132 : vector<1x32xf32> to vector<8x32xf32>
    %134 = arith.addf %131, %133 : vector<8x32xf32>
    %c0_13 = arith.constant 0 : index
    %c0_14 = arith.constant 0 : index
    %135 = vector.load %arg5[%c0_13, %c0_14] : memref<32x64xf32, #tpu.memory_space<vmem>>, vector<32x64xf32>
    %cst_15 = arith.constant dense<0.000000e+00> : vector<8x64xf32>
    %136 = tpu.matmul %1, %135, %cst_15 {dimension_numbers = #tpu.dot_dimension_numbers<[1], [0], [0], [1], [0, 0, 1, 1], [], []>, precision = #tpu.contract_precision<fp32>} : vector<8x32xf32>, vector<32x64xf32>, vector<8x64xf32> -> vector<8x64xf32>
    %137 = arith.addf %41, %136 : vector<8x64xf32>
    %c0_16 = arith.constant 0 : index
    %c0_17 = arith.constant 0 : index
    %138 = vector.load %arg6[%c0_16, %c0_17] : memref<32x64xf32, #tpu.memory_space<vmem>>, vector<32x64xf32>
    %cst_18 = arith.constant dense<0.000000e+00> : vector<8x64xf32>
    %139 = tpu.matmul %1, %138, %cst_18 {dimension_numbers = #tpu.dot_dimension_numbers<[1], [0], [0], [1], [0, 0, 1, 1], [], []>, precision = #tpu.contract_precision<fp32>} : vector<8x32xf32>, vector<32x64xf32>, vector<8x64xf32> -> vector<8x64xf32>
    %140 = arith.addf %80, %139 : vector<8x64xf32>
    %141 = vector.extract_strided_slice %137 {offsets = [0, 0], sizes = [8, 32], strides = [1, 1]} : vector<8x64xf32> to vector<8x32xf32>
    %142 = vector.extract_strided_slice %137 {offsets = [0, 32], sizes = [8, 32], strides = [1, 1]} : vector<8x64xf32> to vector<8x32xf32>
    %143 = vector.extract_strided_slice %140 {offsets = [0, 0], sizes = [8, 32], strides = [1, 1]} : vector<8x64xf32> to vector<8x32xf32>
    %144 = vector.extract_strided_slice %140 {offsets = [0, 32], sizes = [8, 32], strides = [1, 1]} : vector<8x64xf32> to vector<8x32xf32>
    %cst_19 = arith.constant 0.000000e+00 : f32
    %145 = vector.broadcast %cst_19 : f32 to vector<8x32xf32>
    %cst_20 = arith.constant 0.000000e+00 : f32
    %146 = vector.broadcast %cst_20 : f32 to vector<8x32xf32>
    %147 = vector.extract_strided_slice %143 {offsets = [0, 0], sizes = [1, 32], strides = [1, 1]} : vector<8x32xf32> to vector<1x32xf32>
    %148 = vector.broadcast %147 : vector<1x32xf32> to vector<8x32xf32>
    %149 = arith.addf %141, %148 : vector<8x32xf32>
    %cst_21 = arith.constant 0.000000e+00 : f32
    %150 = vector.broadcast %cst_21 : f32 to vector<8x32xf32>
    %151 = arith.maximumf %149, %150 : vector<8x32xf32>
    %152 = vector.extract_strided_slice %144 {offsets = [0, 0], sizes = [1, 32], strides = [1, 1]} : vector<8x32xf32> to vector<1x32xf32>
    %153 = vector.broadcast %152 : vector<1x32xf32> to vector<8x32xf32>
    %154 = arith.addf %142, %153 : vector<8x32xf32>
    %cst_22 = arith.constant 0.000000e+00 : f32
    %155 = vector.broadcast %cst_22 : f32 to vector<8x32xf32>
    %156 = arith.maximumf %154, %155 : vector<8x32xf32>
    %157 = arith.mulf %156, %156 : vector<8x32xf32>
    %cst_23 = arith.constant 0.00999999977 : f32
    %158 = vector.broadcast %cst_23 : f32 to vector<8x32xf32>
    %159 = arith.addf %157, %158 : vector<8x32xf32>
    %cst_24 = arith.constant 1.000000e+00 : f32
    %160 = vector.broadcast %cst_24 : f32 to vector<8x32xf32>
    %161 = arith.divf %160, %159 : vector<8x32xf32>
    %162 = arith.mulf %151, %161 : vector<8x32xf32>
    %163 = arith.addf %145, %162 : vector<8x32xf32>
    %164 = arith.addf %146, %161 : vector<8x32xf32>
    %165 = vector.extract_strided_slice %143 {offsets = [1, 0], sizes = [1, 32], strides = [1, 1]} : vector<8x32xf32> to vector<1x32xf32>
    %166 = vector.broadcast %165 : vector<1x32xf32> to vector<8x32xf32>
    %167 = arith.addf %141, %166 : vector<8x32xf32>
    %cst_25 = arith.constant 0.000000e+00 : f32
    %168 = vector.broadcast %cst_25 : f32 to vector<8x32xf32>
    %169 = arith.maximumf %167, %168 : vector<8x32xf32>
    %170 = vector.extract_strided_slice %144 {offsets = [1, 0], sizes = [1, 32], strides = [1, 1]} : vector<8x32xf32> to vector<1x32xf32>
    %171 = vector.broadcast %170 : vector<1x32xf32> to vector<8x32xf32>
    %172 = arith.addf %142, %171 : vector<8x32xf32>
    %cst_26 = arith.constant 0.000000e+00 : f32
    %173 = vector.broadcast %cst_26 : f32 to vector<8x32xf32>
    %174 = arith.maximumf %172, %173 : vector<8x32xf32>
    %175 = arith.mulf %174, %174 : vector<8x32xf32>
    %cst_27 = arith.constant 0.00999999977 : f32
    %176 = vector.broadcast %cst_27 : f32 to vector<8x32xf32>
    %177 = arith.addf %175, %176 : vector<8x32xf32>
    %cst_28 = arith.constant 1.000000e+00 : f32
    %178 = vector.broadcast %cst_28 : f32 to vector<8x32xf32>
    %179 = arith.divf %178, %177 : vector<8x32xf32>
    %180 = arith.mulf %169, %179 : vector<8x32xf32>
    %181 = arith.addf %163, %180 : vector<8x32xf32>
    %182 = arith.addf %164, %179 : vector<8x32xf32>
    %183 = vector.extract_strided_slice %143 {offsets = [2, 0], sizes = [1, 32], strides = [1, 1]} : vector<8x32xf32> to vector<1x32xf32>
    %184 = vector.broadcast %183 : vector<1x32xf32> to vector<8x32xf32>
    %185 = arith.addf %141, %184 : vector<8x32xf32>
    %cst_29 = arith.constant 0.000000e+00 : f32
    %186 = vector.broadcast %cst_29 : f32 to vector<8x32xf32>
    %187 = arith.maximumf %185, %186 : vector<8x32xf32>
    %188 = vector.extract_strided_slice %144 {offsets = [2, 0], sizes = [1, 32], strides = [1, 1]} : vector<8x32xf32> to vector<1x32xf32>
    %189 = vector.broadcast %188 : vector<1x32xf32> to vector<8x32xf32>
    %190 = arith.addf %142, %189 : vector<8x32xf32>
    %cst_30 = arith.constant 0.000000e+00 : f32
    %191 = vector.broadcast %cst_30 : f32 to vector<8x32xf32>
    %192 = arith.maximumf %190, %191 : vector<8x32xf32>
    %193 = arith.mulf %192, %192 : vector<8x32xf32>
    %cst_31 = arith.constant 0.00999999977 : f32
    %194 = vector.broadcast %cst_31 : f32 to vector<8x32xf32>
    %195 = arith.addf %193, %194 : vector<8x32xf32>
    %cst_32 = arith.constant 1.000000e+00 : f32
    %196 = vector.broadcast %cst_32 : f32 to vector<8x32xf32>
    %197 = arith.divf %196, %195 : vector<8x32xf32>
    %198 = arith.mulf %187, %197 : vector<8x32xf32>
    %199 = arith.addf %181, %198 : vector<8x32xf32>
    %200 = arith.addf %182, %197 : vector<8x32xf32>
    %201 = vector.extract_strided_slice %143 {offsets = [3, 0], sizes = [1, 32], strides = [1, 1]} : vector<8x32xf32> to vector<1x32xf32>
    %202 = vector.broadcast %201 : vector<1x32xf32> to vector<8x32xf32>
    %203 = arith.addf %141, %202 : vector<8x32xf32>
    %cst_33 = arith.constant 0.000000e+00 : f32
    %204 = vector.broadcast %cst_33 : f32 to vector<8x32xf32>
    %205 = arith.maximumf %203, %204 : vector<8x32xf32>
    %206 = vector.extract_strided_slice %144 {offsets = [3, 0], sizes = [1, 32], strides = [1, 1]} : vector<8x32xf32> to vector<1x32xf32>
    %207 = vector.broadcast %206 : vector<1x32xf32> to vector<8x32xf32>
    %208 = arith.addf %142, %207 : vector<8x32xf32>
    %cst_34 = arith.constant 0.000000e+00 : f32
    %209 = vector.broadcast %cst_34 : f32 to vector<8x32xf32>
    %210 = arith.maximumf %208, %209 : vector<8x32xf32>
    %211 = arith.mulf %210, %210 : vector<8x32xf32>
    %cst_35 = arith.constant 0.00999999977 : f32
    %212 = vector.broadcast %cst_35 : f32 to vector<8x32xf32>
    %213 = arith.addf %211, %212 : vector<8x32xf32>
    %cst_36 = arith.constant 1.000000e+00 : f32
    %214 = vector.broadcast %cst_36 : f32 to vector<8x32xf32>
    %215 = arith.divf %214, %213 : vector<8x32xf32>
    %216 = arith.mulf %205, %215 : vector<8x32xf32>
    %217 = arith.addf %199, %216 : vector<8x32xf32>
    %218 = arith.addf %200, %215 : vector<8x32xf32>
    %219 = vector.extract_strided_slice %143 {offsets = [4, 0], sizes = [1, 32], strides = [1, 1]} : vector<8x32xf32> to vector<1x32xf32>
    %220 = vector.broadcast %219 : vector<1x32xf32> to vector<8x32xf32>
    %221 = arith.addf %141, %220 : vector<8x32xf32>
    %cst_37 = arith.constant 0.000000e+00 : f32
    %222 = vector.broadcast %cst_37 : f32 to vector<8x32xf32>
    %223 = arith.maximumf %221, %222 : vector<8x32xf32>
    %224 = vector.extract_strided_slice %144 {offsets = [4, 0], sizes = [1, 32], strides = [1, 1]} : vector<8x32xf32> to vector<1x32xf32>
    %225 = vector.broadcast %224 : vector<1x32xf32> to vector<8x32xf32>
    %226 = arith.addf %142, %225 : vector<8x32xf32>
    %cst_38 = arith.constant 0.000000e+00 : f32
    %227 = vector.broadcast %cst_38 : f32 to vector<8x32xf32>
    %228 = arith.maximumf %226, %227 : vector<8x32xf32>
    %229 = arith.mulf %228, %228 : vector<8x32xf32>
    %cst_39 = arith.constant 0.00999999977 : f32
    %230 = vector.broadcast %cst_39 : f32 to vector<8x32xf32>
    %231 = arith.addf %229, %230 : vector<8x32xf32>
    %cst_40 = arith.constant 1.000000e+00 : f32
    %232 = vector.broadcast %cst_40 : f32 to vector<8x32xf32>
    %233 = arith.divf %232, %231 : vector<8x32xf32>
    %234 = arith.mulf %223, %233 : vector<8x32xf32>
    %235 = arith.addf %217, %234 : vector<8x32xf32>
    %236 = arith.addf %218, %233 : vector<8x32xf32>
    %237 = vector.extract_strided_slice %143 {offsets = [5, 0], sizes = [1, 32], strides = [1, 1]} : vector<8x32xf32> to vector<1x32xf32>
    %238 = vector.broadcast %237 : vector<1x32xf32> to vector<8x32xf32>
    %239 = arith.addf %141, %238 : vector<8x32xf32>
    %cst_41 = arith.constant 0.000000e+00 : f32
    %240 = vector.broadcast %cst_41 : f32 to vector<8x32xf32>
    %241 = arith.maximumf %239, %240 : vector<8x32xf32>
    %242 = vector.extract_strided_slice %144 {offsets = [5, 0], sizes = [1, 32], strides = [1, 1]} : vector<8x32xf32> to vector<1x32xf32>
    %243 = vector.broadcast %242 : vector<1x32xf32> to vector<8x32xf32>
    %244 = arith.addf %142, %243 : vector<8x32xf32>
    %cst_42 = arith.constant 0.000000e+00 : f32
    %245 = vector.broadcast %cst_42 : f32 to vector<8x32xf32>
    %246 = arith.maximumf %244, %245 : vector<8x32xf32>
    %247 = arith.mulf %246, %246 : vector<8x32xf32>
    %cst_43 = arith.constant 0.00999999977 : f32
    %248 = vector.broadcast %cst_43 : f32 to vector<8x32xf32>
    %249 = arith.addf %247, %248 : vector<8x32xf32>
    %cst_44 = arith.constant 1.000000e+00 : f32
    %250 = vector.broadcast %cst_44 : f32 to vector<8x32xf32>
    %251 = arith.divf %250, %249 : vector<8x32xf32>
    %252 = arith.mulf %241, %251 : vector<8x32xf32>
    %253 = arith.addf %235, %252 : vector<8x32xf32>
    %254 = arith.addf %236, %251 : vector<8x32xf32>
    %255 = vector.extract_strided_slice %143 {offsets = [6, 0], sizes = [1, 32], strides = [1, 1]} : vector<8x32xf32> to vector<1x32xf32>
    %256 = vector.broadcast %255 : vector<1x32xf32> to vector<8x32xf32>
    %257 = arith.addf %141, %256 : vector<8x32xf32>
    %cst_45 = arith.constant 0.000000e+00 : f32
    %258 = vector.broadcast %cst_45 : f32 to vector<8x32xf32>
    %259 = arith.maximumf %257, %258 : vector<8x32xf32>
    %260 = vector.extract_strided_slice %144 {offsets = [6, 0], sizes = [1, 32], strides = [1, 1]} : vector<8x32xf32> to vector<1x32xf32>
    %261 = vector.broadcast %260 : vector<1x32xf32> to vector<8x32xf32>
    %262 = arith.addf %142, %261 : vector<8x32xf32>
    %cst_46 = arith.constant 0.000000e+00 : f32
    %263 = vector.broadcast %cst_46 : f32 to vector<8x32xf32>
    %264 = arith.maximumf %262, %263 : vector<8x32xf32>
    %265 = arith.mulf %264, %264 : vector<8x32xf32>
    %cst_47 = arith.constant 0.00999999977 : f32
    %266 = vector.broadcast %cst_47 : f32 to vector<8x32xf32>
    %267 = arith.addf %265, %266 : vector<8x32xf32>
    %cst_48 = arith.constant 1.000000e+00 : f32
    %268 = vector.broadcast %cst_48 : f32 to vector<8x32xf32>
    %269 = arith.divf %268, %267 : vector<8x32xf32>
    %270 = arith.mulf %259, %269 : vector<8x32xf32>
    %271 = arith.addf %253, %270 : vector<8x32xf32>
    %272 = arith.addf %254, %269 : vector<8x32xf32>
    %273 = vector.extract_strided_slice %143 {offsets = [7, 0], sizes = [1, 32], strides = [1, 1]} : vector<8x32xf32> to vector<1x32xf32>
    %274 = vector.broadcast %273 : vector<1x32xf32> to vector<8x32xf32>
    %275 = arith.addf %141, %274 : vector<8x32xf32>
    %cst_49 = arith.constant 0.000000e+00 : f32
    %276 = vector.broadcast %cst_49 : f32 to vector<8x32xf32>
    %277 = arith.maximumf %275, %276 : vector<8x32xf32>
    %278 = vector.extract_strided_slice %144 {offsets = [7, 0], sizes = [1, 32], strides = [1, 1]} : vector<8x32xf32> to vector<1x32xf32>
    %279 = vector.broadcast %278 : vector<1x32xf32> to vector<8x32xf32>
    %280 = arith.addf %142, %279 : vector<8x32xf32>
    %cst_50 = arith.constant 0.000000e+00 : f32
    %281 = vector.broadcast %cst_50 : f32 to vector<8x32xf32>
    %282 = arith.maximumf %280, %281 : vector<8x32xf32>
    %283 = arith.mulf %282, %282 : vector<8x32xf32>
    %cst_51 = arith.constant 0.00999999977 : f32
    %284 = vector.broadcast %cst_51 : f32 to vector<8x32xf32>
    %285 = arith.addf %283, %284 : vector<8x32xf32>
    %cst_52 = arith.constant 1.000000e+00 : f32
    %286 = vector.broadcast %cst_52 : f32 to vector<8x32xf32>
    %287 = arith.divf %286, %285 : vector<8x32xf32>
    %288 = arith.mulf %277, %287 : vector<8x32xf32>
    %289 = arith.addf %271, %288 : vector<8x32xf32>
    %290 = arith.addf %272, %287 : vector<8x32xf32>
    %291 = arith.divf %289, %290 : vector<8x32xf32>
    %292 = arith.addf %1, %291 : vector<8x32xf32>
    %cst_53 = arith.constant dense<0.000000e+00> : vector<8x32xf32>
    %293 = tpu.matmul %292, %3, %cst_53 {dimension_numbers = #tpu.dot_dimension_numbers<[1], [0], [0], [1], [0, 0, 1, 1], [], []>, precision = #tpu.contract_precision<fp32>} : vector<8x32xf32>, vector<32x32xf32>, vector<8x32xf32> -> vector<8x32xf32>
    %294 = arith.addf %134, %293 : vector<8x32xf32>
    %cst_54 = arith.constant 0.000000e+00 : f32
    %295 = vector.broadcast %cst_54 : f32 to vector<8x32xf32>
    %296 = arith.maximumf %294, %295 : vector<8x32xf32>
    %c0_55 = arith.constant 0 : index
    %c0_56 = arith.constant 0 : index
    %297 = vector.load %arg10[%c0_55, %c0_56] : memref<32x32xf32, #tpu.memory_space<vmem>>, vector<32x32xf32>
    %cst_57 = arith.constant dense<0.000000e+00> : vector<8x32xf32>
    %298 = tpu.matmul %296, %297, %cst_57 {dimension_numbers = #tpu.dot_dimension_numbers<[1], [0], [0], [1], [0, 0, 1, 1], [], []>, precision = #tpu.contract_precision<fp32>} : vector<8x32xf32>, vector<32x32xf32>, vector<8x32xf32> -> vector<8x32xf32>
    %c0_58 = arith.constant 0 : index
    %c0_59 = arith.constant 0 : index
    %299 = vector.load %arg11[%c0_58, %c0_59] : memref<1x32xf32, #tpu.memory_space<vmem>>, vector<1x32xf32>
    %300 = vector.broadcast %299 : vector<1x32xf32> to vector<8x32xf32>
    %301 = arith.addf %298, %300 : vector<8x32xf32>
    %c0_60 = arith.constant 0 : index
    %c0_61 = arith.constant 0 : index
    %302 = vector.load %arg5[%c0_60, %c0_61] : memref<32x64xf32, #tpu.memory_space<vmem>>, vector<32x64xf32>
    %cst_62 = arith.constant dense<0.000000e+00> : vector<8x64xf32>
    %303 = tpu.matmul %301, %302, %cst_62 {dimension_numbers = #tpu.dot_dimension_numbers<[1], [0], [0], [1], [0, 0, 1, 1], [], []>, precision = #tpu.contract_precision<fp32>} : vector<8x32xf32>, vector<32x64xf32>, vector<8x64xf32> -> vector<8x64xf32>
    %304 = arith.addf %41, %303 : vector<8x64xf32>
    %c0_63 = arith.constant 0 : index
    %c0_64 = arith.constant 0 : index
    %305 = vector.load %arg6[%c0_63, %c0_64] : memref<32x64xf32, #tpu.memory_space<vmem>>, vector<32x64xf32>
    %cst_65 = arith.constant dense<0.000000e+00> : vector<8x64xf32>
    %306 = tpu.matmul %301, %305, %cst_65 {dimension_numbers = #tpu.dot_dimension_numbers<[1], [0], [0], [1], [0, 0, 1, 1], [], []>, precision = #tpu.contract_precision<fp32>} : vector<8x32xf32>, vector<32x64xf32>, vector<8x64xf32> -> vector<8x64xf32>
    %307 = arith.addf %80, %306 : vector<8x64xf32>
    %308 = vector.extract_strided_slice %304 {offsets = [0, 0], sizes = [8, 32], strides = [1, 1]} : vector<8x64xf32> to vector<8x32xf32>
    %309 = vector.extract_strided_slice %304 {offsets = [0, 32], sizes = [8, 32], strides = [1, 1]} : vector<8x64xf32> to vector<8x32xf32>
    %310 = vector.extract_strided_slice %307 {offsets = [0, 0], sizes = [8, 32], strides = [1, 1]} : vector<8x64xf32> to vector<8x32xf32>
    %311 = vector.extract_strided_slice %307 {offsets = [0, 32], sizes = [8, 32], strides = [1, 1]} : vector<8x64xf32> to vector<8x32xf32>
    %cst_66 = arith.constant 0.000000e+00 : f32
    %312 = vector.broadcast %cst_66 : f32 to vector<8x32xf32>
    %cst_67 = arith.constant 0.000000e+00 : f32
    %313 = vector.broadcast %cst_67 : f32 to vector<8x32xf32>
    %314 = vector.extract_strided_slice %310 {offsets = [0, 0], sizes = [1, 32], strides = [1, 1]} : vector<8x32xf32> to vector<1x32xf32>
    %315 = vector.broadcast %314 : vector<1x32xf32> to vector<8x32xf32>
    %316 = arith.addf %308, %315 : vector<8x32xf32>
    %cst_68 = arith.constant 0.000000e+00 : f32
    %317 = vector.broadcast %cst_68 : f32 to vector<8x32xf32>
    %318 = arith.maximumf %316, %317 : vector<8x32xf32>
    %319 = vector.extract_strided_slice %311 {offsets = [0, 0], sizes = [1, 32], strides = [1, 1]} : vector<8x32xf32> to vector<1x32xf32>
    %320 = vector.broadcast %319 : vector<1x32xf32> to vector<8x32xf32>
    %321 = arith.addf %309, %320 : vector<8x32xf32>
    %cst_69 = arith.constant 0.000000e+00 : f32
    %322 = vector.broadcast %cst_69 : f32 to vector<8x32xf32>
    %323 = arith.maximumf %321, %322 : vector<8x32xf32>
    %324 = arith.mulf %323, %323 : vector<8x32xf32>
    %cst_70 = arith.constant 0.00999999977 : f32
    %325 = vector.broadcast %cst_70 : f32 to vector<8x32xf32>
    %326 = arith.addf %324, %325 : vector<8x32xf32>
    %cst_71 = arith.constant 1.000000e+00 : f32
    %327 = vector.broadcast %cst_71 : f32 to vector<8x32xf32>
    %328 = arith.divf %327, %326 : vector<8x32xf32>
    %329 = arith.mulf %318, %328 : vector<8x32xf32>
    %330 = arith.addf %312, %329 : vector<8x32xf32>
    %331 = arith.addf %313, %328 : vector<8x32xf32>
    %332 = vector.extract_strided_slice %310 {offsets = [1, 0], sizes = [1, 32], strides = [1, 1]} : vector<8x32xf32> to vector<1x32xf32>
    %333 = vector.broadcast %332 : vector<1x32xf32> to vector<8x32xf32>
    %334 = arith.addf %308, %333 : vector<8x32xf32>
    %cst_72 = arith.constant 0.000000e+00 : f32
    %335 = vector.broadcast %cst_72 : f32 to vector<8x32xf32>
    %336 = arith.maximumf %334, %335 : vector<8x32xf32>
    %337 = vector.extract_strided_slice %311 {offsets = [1, 0], sizes = [1, 32], strides = [1, 1]} : vector<8x32xf32> to vector<1x32xf32>
    %338 = vector.broadcast %337 : vector<1x32xf32> to vector<8x32xf32>
    %339 = arith.addf %309, %338 : vector<8x32xf32>
    %cst_73 = arith.constant 0.000000e+00 : f32
    %340 = vector.broadcast %cst_73 : f32 to vector<8x32xf32>
    %341 = arith.maximumf %339, %340 : vector<8x32xf32>
    %342 = arith.mulf %341, %341 : vector<8x32xf32>
    %cst_74 = arith.constant 0.00999999977 : f32
    %343 = vector.broadcast %cst_74 : f32 to vector<8x32xf32>
    %344 = arith.addf %342, %343 : vector<8x32xf32>
    %cst_75 = arith.constant 1.000000e+00 : f32
    %345 = vector.broadcast %cst_75 : f32 to vector<8x32xf32>
    %346 = arith.divf %345, %344 : vector<8x32xf32>
    %347 = arith.mulf %336, %346 : vector<8x32xf32>
    %348 = arith.addf %330, %347 : vector<8x32xf32>
    %349 = arith.addf %331, %346 : vector<8x32xf32>
    %350 = vector.extract_strided_slice %310 {offsets = [2, 0], sizes = [1, 32], strides = [1, 1]} : vector<8x32xf32> to vector<1x32xf32>
    %351 = vector.broadcast %350 : vector<1x32xf32> to vector<8x32xf32>
    %352 = arith.addf %308, %351 : vector<8x32xf32>
    %cst_76 = arith.constant 0.000000e+00 : f32
    %353 = vector.broadcast %cst_76 : f32 to vector<8x32xf32>
    %354 = arith.maximumf %352, %353 : vector<8x32xf32>
    %355 = vector.extract_strided_slice %311 {offsets = [2, 0], sizes = [1, 32], strides = [1, 1]} : vector<8x32xf32> to vector<1x32xf32>
    %356 = vector.broadcast %355 : vector<1x32xf32> to vector<8x32xf32>
    %357 = arith.addf %309, %356 : vector<8x32xf32>
    %cst_77 = arith.constant 0.000000e+00 : f32
    %358 = vector.broadcast %cst_77 : f32 to vector<8x32xf32>
    %359 = arith.maximumf %357, %358 : vector<8x32xf32>
    %360 = arith.mulf %359, %359 : vector<8x32xf32>
    %cst_78 = arith.constant 0.00999999977 : f32
    %361 = vector.broadcast %cst_78 : f32 to vector<8x32xf32>
    %362 = arith.addf %360, %361 : vector<8x32xf32>
    %cst_79 = arith.constant 1.000000e+00 : f32
    %363 = vector.broadcast %cst_79 : f32 to vector<8x32xf32>
    %364 = arith.divf %363, %362 : vector<8x32xf32>
    %365 = arith.mulf %354, %364 : vector<8x32xf32>
    %366 = arith.addf %348, %365 : vector<8x32xf32>
    %367 = arith.addf %349, %364 : vector<8x32xf32>
    %368 = vector.extract_strided_slice %310 {offsets = [3, 0], sizes = [1, 32], strides = [1, 1]} : vector<8x32xf32> to vector<1x32xf32>
    %369 = vector.broadcast %368 : vector<1x32xf32> to vector<8x32xf32>
    %370 = arith.addf %308, %369 : vector<8x32xf32>
    %cst_80 = arith.constant 0.000000e+00 : f32
    %371 = vector.broadcast %cst_80 : f32 to vector<8x32xf32>
    %372 = arith.maximumf %370, %371 : vector<8x32xf32>
    %373 = vector.extract_strided_slice %311 {offsets = [3, 0], sizes = [1, 32], strides = [1, 1]} : vector<8x32xf32> to vector<1x32xf32>
    %374 = vector.broadcast %373 : vector<1x32xf32> to vector<8x32xf32>
    %375 = arith.addf %309, %374 : vector<8x32xf32>
    %cst_81 = arith.constant 0.000000e+00 : f32
    %376 = vector.broadcast %cst_81 : f32 to vector<8x32xf32>
    %377 = arith.maximumf %375, %376 : vector<8x32xf32>
    %378 = arith.mulf %377, %377 : vector<8x32xf32>
    %cst_82 = arith.constant 0.00999999977 : f32
    %379 = vector.broadcast %cst_82 : f32 to vector<8x32xf32>
    %380 = arith.addf %378, %379 : vector<8x32xf32>
    %cst_83 = arith.constant 1.000000e+00 : f32
    %381 = vector.broadcast %cst_83 : f32 to vector<8x32xf32>
    %382 = arith.divf %381, %380 : vector<8x32xf32>
    %383 = arith.mulf %372, %382 : vector<8x32xf32>
    %384 = arith.addf %366, %383 : vector<8x32xf32>
    %385 = arith.addf %367, %382 : vector<8x32xf32>
    %386 = vector.extract_strided_slice %310 {offsets = [4, 0], sizes = [1, 32], strides = [1, 1]} : vector<8x32xf32> to vector<1x32xf32>
    %387 = vector.broadcast %386 : vector<1x32xf32> to vector<8x32xf32>
    %388 = arith.addf %308, %387 : vector<8x32xf32>
    %cst_84 = arith.constant 0.000000e+00 : f32
    %389 = vector.broadcast %cst_84 : f32 to vector<8x32xf32>
    %390 = arith.maximumf %388, %389 : vector<8x32xf32>
    %391 = vector.extract_strided_slice %311 {offsets = [4, 0], sizes = [1, 32], strides = [1, 1]} : vector<8x32xf32> to vector<1x32xf32>
    %392 = vector.broadcast %391 : vector<1x32xf32> to vector<8x32xf32>
    %393 = arith.addf %309, %392 : vector<8x32xf32>
    %cst_85 = arith.constant 0.000000e+00 : f32
    %394 = vector.broadcast %cst_85 : f32 to vector<8x32xf32>
    %395 = arith.maximumf %393, %394 : vector<8x32xf32>
    %396 = arith.mulf %395, %395 : vector<8x32xf32>
    %cst_86 = arith.constant 0.00999999977 : f32
    %397 = vector.broadcast %cst_86 : f32 to vector<8x32xf32>
    %398 = arith.addf %396, %397 : vector<8x32xf32>
    %cst_87 = arith.constant 1.000000e+00 : f32
    %399 = vector.broadcast %cst_87 : f32 to vector<8x32xf32>
    %400 = arith.divf %399, %398 : vector<8x32xf32>
    %401 = arith.mulf %390, %400 : vector<8x32xf32>
    %402 = arith.addf %384, %401 : vector<8x32xf32>
    %403 = arith.addf %385, %400 : vector<8x32xf32>
    %404 = vector.extract_strided_slice %310 {offsets = [5, 0], sizes = [1, 32], strides = [1, 1]} : vector<8x32xf32> to vector<1x32xf32>
    %405 = vector.broadcast %404 : vector<1x32xf32> to vector<8x32xf32>
    %406 = arith.addf %308, %405 : vector<8x32xf32>
    %cst_88 = arith.constant 0.000000e+00 : f32
    %407 = vector.broadcast %cst_88 : f32 to vector<8x32xf32>
    %408 = arith.maximumf %406, %407 : vector<8x32xf32>
    %409 = vector.extract_strided_slice %311 {offsets = [5, 0], sizes = [1, 32], strides = [1, 1]} : vector<8x32xf32> to vector<1x32xf32>
    %410 = vector.broadcast %409 : vector<1x32xf32> to vector<8x32xf32>
    %411 = arith.addf %309, %410 : vector<8x32xf32>
    %cst_89 = arith.constant 0.000000e+00 : f32
    %412 = vector.broadcast %cst_89 : f32 to vector<8x32xf32>
    %413 = arith.maximumf %411, %412 : vector<8x32xf32>
    %414 = arith.mulf %413, %413 : vector<8x32xf32>
    %cst_90 = arith.constant 0.00999999977 : f32
    %415 = vector.broadcast %cst_90 : f32 to vector<8x32xf32>
    %416 = arith.addf %414, %415 : vector<8x32xf32>
    %cst_91 = arith.constant 1.000000e+00 : f32
    %417 = vector.broadcast %cst_91 : f32 to vector<8x32xf32>
    %418 = arith.divf %417, %416 : vector<8x32xf32>
    %419 = arith.mulf %408, %418 : vector<8x32xf32>
    %420 = arith.addf %402, %419 : vector<8x32xf32>
    %421 = arith.addf %403, %418 : vector<8x32xf32>
    %422 = vector.extract_strided_slice %310 {offsets = [6, 0], sizes = [1, 32], strides = [1, 1]} : vector<8x32xf32> to vector<1x32xf32>
    %423 = vector.broadcast %422 : vector<1x32xf32> to vector<8x32xf32>
    %424 = arith.addf %308, %423 : vector<8x32xf32>
    %cst_92 = arith.constant 0.000000e+00 : f32
    %425 = vector.broadcast %cst_92 : f32 to vector<8x32xf32>
    %426 = arith.maximumf %424, %425 : vector<8x32xf32>
    %427 = vector.extract_strided_slice %311 {offsets = [6, 0], sizes = [1, 32], strides = [1, 1]} : vector<8x32xf32> to vector<1x32xf32>
    %428 = vector.broadcast %427 : vector<1x32xf32> to vector<8x32xf32>
    %429 = arith.addf %309, %428 : vector<8x32xf32>
    %cst_93 = arith.constant 0.000000e+00 : f32
    %430 = vector.broadcast %cst_93 : f32 to vector<8x32xf32>
    %431 = arith.maximumf %429, %430 : vector<8x32xf32>
    %432 = arith.mulf %431, %431 : vector<8x32xf32>
    %cst_94 = arith.constant 0.00999999977 : f32
    %433 = vector.broadcast %cst_94 : f32 to vector<8x32xf32>
    %434 = arith.addf %432, %433 : vector<8x32xf32>
    %cst_95 = arith.constant 1.000000e+00 : f32
    %435 = vector.broadcast %cst_95 : f32 to vector<8x32xf32>
    %436 = arith.divf %435, %434 : vector<8x32xf32>
    %437 = arith.mulf %426, %436 : vector<8x32xf32>
    %438 = arith.addf %420, %437 : vector<8x32xf32>
    %439 = arith.addf %421, %436 : vector<8x32xf32>
    %440 = vector.extract_strided_slice %310 {offsets = [7, 0], sizes = [1, 32], strides = [1, 1]} : vector<8x32xf32> to vector<1x32xf32>
    %441 = vector.broadcast %440 : vector<1x32xf32> to vector<8x32xf32>
    %442 = arith.addf %308, %441 : vector<8x32xf32>
    %cst_96 = arith.constant 0.000000e+00 : f32
    %443 = vector.broadcast %cst_96 : f32 to vector<8x32xf32>
    %444 = arith.maximumf %442, %443 : vector<8x32xf32>
    %445 = vector.extract_strided_slice %311 {offsets = [7, 0], sizes = [1, 32], strides = [1, 1]} : vector<8x32xf32> to vector<1x32xf32>
    %446 = vector.broadcast %445 : vector<1x32xf32> to vector<8x32xf32>
    %447 = arith.addf %309, %446 : vector<8x32xf32>
    %cst_97 = arith.constant 0.000000e+00 : f32
    %448 = vector.broadcast %cst_97 : f32 to vector<8x32xf32>
    %449 = arith.maximumf %447, %448 : vector<8x32xf32>
    %450 = arith.mulf %449, %449 : vector<8x32xf32>
    %cst_98 = arith.constant 0.00999999977 : f32
    %451 = vector.broadcast %cst_98 : f32 to vector<8x32xf32>
    %452 = arith.addf %450, %451 : vector<8x32xf32>
    %cst_99 = arith.constant 1.000000e+00 : f32
    %453 = vector.broadcast %cst_99 : f32 to vector<8x32xf32>
    %454 = arith.divf %453, %452 : vector<8x32xf32>
    %455 = arith.mulf %444, %454 : vector<8x32xf32>
    %456 = arith.addf %438, %455 : vector<8x32xf32>
    %457 = arith.addf %439, %454 : vector<8x32xf32>
    %458 = arith.divf %456, %457 : vector<8x32xf32>
    %459 = arith.addf %301, %458 : vector<8x32xf32>
    %cst_100 = arith.constant dense<0.000000e+00> : vector<8x32xf32>
    %460 = tpu.matmul %459, %3, %cst_100 {dimension_numbers = #tpu.dot_dimension_numbers<[1], [0], [0], [1], [0, 0, 1, 1], [], []>, precision = #tpu.contract_precision<fp32>} : vector<8x32xf32>, vector<32x32xf32>, vector<8x32xf32> -> vector<8x32xf32>
    %461 = arith.addf %134, %460 : vector<8x32xf32>
    %cst_101 = arith.constant 0.000000e+00 : f32
    %462 = vector.broadcast %cst_101 : f32 to vector<8x32xf32>
    %463 = arith.maximumf %461, %462 : vector<8x32xf32>
    %c0_102 = arith.constant 0 : index
    %c0_103 = arith.constant 0 : index
    %464 = vector.load %arg10[%c0_102, %c0_103] : memref<32x32xf32, #tpu.memory_space<vmem>>, vector<32x32xf32>
    %cst_104 = arith.constant dense<0.000000e+00> : vector<8x32xf32>
    %465 = tpu.matmul %463, %464, %cst_104 {dimension_numbers = #tpu.dot_dimension_numbers<[1], [0], [0], [1], [0, 0, 1, 1], [], []>, precision = #tpu.contract_precision<fp32>} : vector<8x32xf32>, vector<32x32xf32>, vector<8x32xf32> -> vector<8x32xf32>
    %c0_105 = arith.constant 0 : index
    %c0_106 = arith.constant 0 : index
    %466 = vector.load %arg11[%c0_105, %c0_106] : memref<1x32xf32, #tpu.memory_space<vmem>>, vector<1x32xf32>
    %467 = vector.broadcast %466 : vector<1x32xf32> to vector<8x32xf32>
    %468 = arith.addf %465, %467 : vector<8x32xf32>
    %c0_107 = arith.constant 0 : index
    %c0_108 = arith.constant 0 : index
    %469 = vector.load %arg16[%c0_107, %c0_108] : memref<8x32xf32, #tpu.memory_space<vmem>>, vector<8x32xf32>
    tpu.vector_store %arg16[%c0_107, %c0_108], %468 {strides = array<i32>} : memref<8x32xf32, #tpu.memory_space<vmem>>, vector<8x32xf32>,
    %c0_109 = arith.constant 0 : index
    %c0_110 = arith.constant 0 : index
    %470 = vector.load %arg12[%c0_109, %c0_110] : memref<32x128xf32, #tpu.memory_space<vmem>>, vector<32x128xf32>
    %cst_111 = arith.constant dense<0.000000e+00> : vector<8x128xf32>
    %471 = tpu.matmul %468, %470, %cst_111 {dimension_numbers = #tpu.dot_dimension_numbers<[1], [0], [0], [1], [0, 0, 1, 1], [], []>, precision = #tpu.contract_precision<fp32>} : vector<8x32xf32>, vector<32x128xf32>, vector<8x128xf32> -> vector<8x128xf32>
    %c0_112 = arith.constant 0 : index
    %c0_113 = arith.constant 0 : index
    %472 = vector.load %arg13[%c0_112, %c0_113] : memref<1x128xf32, #tpu.memory_space<vmem>>, vector<1x128xf32>
    %473 = vector.broadcast %472 : vector<1x128xf32> to vector<8x128xf32>
    %474 = arith.addf %471, %473 : vector<8x128xf32>
    %cst_114 = arith.constant 0.000000e+00 : f32
    %475 = vector.broadcast %cst_114 : f32 to vector<8x128xf32>
    %476 = arith.maximumf %474, %475 : vector<8x128xf32>
    %c0_115 = arith.constant 0 : index
    %c0_116 = arith.constant 0 : index
    %477 = vector.load %arg14[%c0_115, %c0_116] : memref<128x8xf32, #tpu.memory_space<vmem>>, vector<128x8xf32>
    %cst_117 = arith.constant dense<0.000000e+00> : vector<8x8xf32>
    %478 = tpu.matmul %476, %477, %cst_117 {dimension_numbers = #tpu.dot_dimension_numbers<[1], [0], [0], [1], [0, 0, 1, 1], [], []>, precision = #tpu.contract_precision<fp32>} : vector<8x128xf32>, vector<128x8xf32>, vector<8x8xf32> -> vector<8x8xf32>
    %c0_118 = arith.constant 0 : index
    %c0_119 = arith.constant 0 : index
    %479 = vector.load %arg15[%c0_118, %c0_119] : memref<1x8xf32, #tpu.memory_space<vmem>>, vector<1x8xf32>
    %480 = vector.broadcast %479 : vector<1x8xf32> to vector<8x8xf32>
    %481 = arith.addf %478, %480 : vector<8x8xf32>
    %c0_120 = arith.constant 0 : index
    %c0_121 = arith.constant 0 : index
    %482 = vector.load %arg17[%c0_120, %c0_121] : memref<8x8xf32, #tpu.memory_space<vmem>>, vector<8x8xf32>
    tpu.vector_store %arg17[%c0_120, %c0_121], %481 {strides = array<i32>} : memref<8x8xf32, #tpu.memory_space<vmem>>, vector<8x8xf32>,
    return
  }
  func.func @transform_0(%arg0: i32) -> (i32, i32) {
    %c0_i32 = arith.constant 0 : i32
    %c0_i32_0 = arith.constant 0 : i32
    %c0_i32_1 = arith.constant 0 : i32
    return %c0_i32, %c0_i32_0 : i32, i32
  }
  func.func @transform_1(%arg0: i32) -> (i32, i32) {
    %c0_i32 = arith.constant 0 : i32
    %c0_i32_0 = arith.constant 0 : i32
    %c0_i32_1 = arith.constant 0 : i32
    return %c0_i32, %c0_i32_0 : i32, i32
  }
  func.func @transform_2(%arg0: i32) -> (i32, i32) {
    %c0_i32 = arith.constant 0 : i32
    %c0_i32_0 = arith.constant 0 : i32
    %c0_i32_1 = arith.constant 0 : i32
    return %c0_i32, %c0_i32_0 : i32, i32
  }
  func.func @transform_3(%arg0: i32) -> (i32, i32) {
    %c0_i32 = arith.constant 0 : i32
    %c0_i32_0 = arith.constant 0 : i32
    %c0_i32_1 = arith.constant 0 : i32
    return %c0_i32, %c0_i32_0 : i32, i32
  }
  func.func @transform_4(%arg0: i32) -> (i32, i32) {
    %c0_i32 = arith.constant 0 : i32
    %c0_i32_0 = arith.constant 0 : i32
    %c0_i32_1 = arith.constant 0 : i32
    return %c0_i32, %c0_i32_0 : i32, i32
  }
  func.func @transform_5(%arg0: i32) -> (i32, i32) {
    %c0_i32 = arith.constant 0 : i32
    %c0_i32_0 = arith.constant 0 : i32
    %c0_i32_1 = arith.constant 0 : i32
    return %c0_i32, %c0_i32_0 : i32, i32
  }
  func.func @transform_6(%arg0: i32) -> (i32, i32) {
    %c0_i32 = arith.constant 0 : i32
    %c0_i32_0 = arith.constant 0 : i32
    %c0_i32_1 = arith.constant 0 : i32
    return %c0_i32, %c0_i32_0 : i32, i32
  }
  func.func @transform_7(%arg0: i32) -> (i32, i32) {
    %c0_i32 = arith.constant 0 : i32
    %c0_i32_0 = arith.constant 0 : i32
    %c0_i32_1 = arith.constant 0 : i32
    return %c0_i32, %c0_i32_0 : i32, i32
  }
  func.func @transform_8(%arg0: i32) -> (i32, i32) {
    %c0_i32 = arith.constant 0 : i32
    %c0_i32_0 = arith.constant 0 : i32
    %c0_i32_1 = arith.constant 0 : i32
    return %c0_i32, %c0_i32_0 : i32, i32
  }
  func.func @transform_9(%arg0: i32) -> (i32, i32) {
    %c0_i32 = arith.constant 0 : i32
    %c0_i32_0 = arith.constant 0 : i32
    %c0_i32_1 = arith.constant 0 : i32
    return %c0_i32, %c0_i32_0 : i32, i32
  }
  func.func @transform_10(%arg0: i32) -> (i32, i32) {
    %c0_i32 = arith.constant 0 : i32
    %c0_i32_0 = arith.constant 0 : i32
    %c0_i32_1 = arith.constant 0 : i32
    return %c0_i32, %c0_i32_0 : i32, i32
  }
  func.func @transform_11(%arg0: i32) -> (i32, i32) {
    %c0_i32 = arith.constant 0 : i32
    %c0_i32_0 = arith.constant 0 : i32
    %c0_i32_1 = arith.constant 0 : i32
    return %c0_i32, %c0_i32_0 : i32, i32
  }
  func.func @transform_12(%arg0: i32) -> (i32, i32) {
    %c0_i32 = arith.constant 0 : i32
    %c0_i32_0 = arith.constant 0 : i32
    %c0_i32_1 = arith.constant 0 : i32
    return %c0_i32, %c0_i32_0 : i32, i32
  }
  func.func @transform_13(%arg0: i32) -> (i32, i32) {
    %c0_i32 = arith.constant 0 : i32
    %c0_i32_0 = arith.constant 0 : i32
    %c0_i32_1 = arith.constant 0 : i32
    return %c0_i32, %c0_i32_0 : i32, i32
  }
  func.func @transform_14(%arg0: i32) -> (i32, i32) {
    %c0_i32 = arith.constant 0 : i32
    %c0_i32_0 = arith.constant 0 : i32
    %c0_i32_1 = arith.constant 0 : i32
    return %c0_i32, %c0_i32_0 : i32, i32
  }
  func.func @transform_15(%arg0: i32) -> (i32, i32) {
    %c0_i32 = arith.constant 0 : i32
    %c0_i32_0 = arith.constant 0 : i32
    %c0_i32_1 = arith.constant 0 : i32
    return %c0_i32, %c0_i32_0 : i32, i32
  }
  func.func @transform_16(%arg0: i32) -> (i32, i32) {
    %c0_i32 = arith.constant 0 : i32
    %c0_i32_0 = arith.constant 0 : i32
    %c0_i32_1 = arith.constant 0 : i32
    return %c0_i32, %c0_i32_0 : i32, i32
  }
}

</mosaic_0001>

<bundles_post_ra>
// kernel: local_processing_forward.1
= control target key start
LH: loop header
LB: loop body
LE: loop exit
PB: predicated region body
PF: predicated region fallthrough
CT: control target
= control target key end

     0   :  { %vm264_vm0 = vcmask 261120   ;;  %v8612_v0 = vmov 0.0|0.0   ;;  %vm7399_vm1 = vmmov 0   ;;  %v8609_v8 = vmov 0.0   ;;  %s8591_s4 = inlined_call_operand.vmem [shape: f32[32,64], index: 4, kind: input, shape index: {}]   ;;  %s8592_s1 = inlined_call_operand.vmem [shape: f32[8,32], index: 1, kind: input, shape index: {}]   ;;  %s8593_s0 = inlined_call_operand.vmem [shape: f32[8,6], index: 0, kind: input, shape index: {}]   ;;  %s8594_s5 = inlined_call_operand.vmem [shape: f32[32,64], index: 5, kind: input, shape index: {}]   ;;  %s8595_s7 = inlined_call_operand.vmem [shape: f32[40,32], index: 7, kind: input, shape index: {}]   ;;  %s8596_s3 = inlined_call_operand.vmem [shape: f32[6,64], index: 3, kind: input, shape index: {}]   ;;  %s8597_s2 = inlined_call_operand.vmem [shape: f32[6,64], index: 2, kind: input, shape index: {}]   ;;  %s8598_s6 = inlined_call_operand.vmem [shape: f32[1,64], index: 6, kind: input, shape index: {}]   ;;  %s8599_s9 = inlined_call_operand.vmem [shape: f32[32,32], index: 9, kind: input, shape index: {}]   ;;  %s8600_s8 = inlined_call_operand.vmem [shape: f32[1,32], index: 8, kind: input, shape index: {}]   ;;  %s8601_s10 = inlined_call_operand.vmem [shape: f32[1,32], index: 10, kind: input, shape index: {}]   ;;  %s8602_s11 = inlined_call_operand.vmem [shape: f32[32,128], index: 11, kind: input, shape index: {}]   ;;  %s8603_s13 = inlined_call_operand.vmem [shape: f32[128,8], index: 13, kind: input, shape index: {}]   ;;  %s8604_s15 = inlined_call_operand.vmem [shape: f32[8,32], index: 15, kind: output, shape index: {0}]   ;;  %s8605_s12 = inlined_call_operand.vmem [shape: f32[1,128], index: 12, kind: input, shape index: {}]   ;;  %s8606_s14 = inlined_call_operand.vmem [shape: f32[1,8], index: 14, kind: input, shape index: {}]   ;;  %s8607_s16 = inlined_call_operand.vmem [shape: f32[8,8], index: 16, kind: output, shape index: {1}]  }
   0x1   :  { %8616 = sst [smem:[#allocation4_spill]] %s8591_s4  ;;  %6828 = vmatprep.subr.bf16.mxu0 %v8612_v0  ;;  %6834 = vmatprep.subr.bf16.mxu1 %v8612_v0  ;;  %v7512_v9 = vld [vmem:[%s8592_s1] sm:$0xff]  ;;  %v7401_v12 = vmov 2   ;;  %v7402_v13 = vmov 0   ;;  %v8611_v32 = vmov 1   ;;  %v755_v40 = vld [vmem:[%s8594_s5 + $0x8] sm:$0xff] }
   0x2   :  { %s8617_s23 = sld [smem:[#allocation4_spill]]  ;;  %6032 = vmatprep.mubr.msk.f32.mxu0 %vm7399_vm1, %v8609_v8  ;;  %6043 = vmatprep.mubr.msk.f32.mxu1 %vm7399_vm1, %v8609_v8  ;;  %v266_v11 = vsel %vm264_vm0, %v7512_v9, 0  ;;  %v7529_v18 = vld [vmem:[%s8593_s0] sm:$0xff]  ;;  %v762_v45 = vand.u32 4294901760, %v755_v40  ;;  %v756_v48 = vld [vmem:[%s8594_s5 + $0x10] sm:$0xff]  ;;  %v757_v49 = vld [vmem:[%s8594_s5 + $0x18] sm:$0xff] }
   0x3   :  { %7351 = vset.pattern.permute.xlu1 %v7401_v12  ;;  %7349 = vset.pattern.permute.xlu0 %v7402_v13  ;;  %v7524_v17 = vand.u32 4294901760, %v266_v11  ;;  %v754_v36 = vld [vmem:[%s8594_s5] sm:$0xff]  ;;  %v7578_v46 = vmul.f32 0.1, %v7529_v18  ;;  %v7404_v50 = vmov 3   ;;  %v765_v51 = vand.u32 4294901760, %v756_v48 }
   0x4   :  { %144 = vperm.xlu1 %7351, %v7529_v18   ;;  %125 = vperm.xlu0 %7349, %v7529_v18   ;;  %v759_v43 = vand.u32 4294901760, %v754_v36  ;;  %v768_v52 = vand.u32 4294901760, %v757_v49  ;;  %v7599_v54 = vsub.f32 %v755_v40, %v762_v45  ;;  %vm5637_vm2 = vcmask 64512  }
   0x5   :  { %v7542_v24 = vsub.f32 %v266_v11, %v7524_v17  ;;  %v7613_v58 = vsub.f32 %v756_v48, %v765_v51 }
   0x6   :  { %v7597_v53 = vsub.f32 %v754_v36, %v759_v43  ;;  %v847_v57 = vand.u32 4294901760, %v7599_v54  ;;  %v7615_v59 = vsub.f32 %v757_v49, %v768_v52 }
   0x7   :  { %v7549_v29 = vand.u32 4294901760, %v7542_v24  ;;  %v854_v63 = vand.u32 4294901760, %v7613_v58 }
   0x8   :  { %v260_v1 = vld [vmem:[%s8617_s23] sm:$0xff]  ;;  %v261_v2 = vld [vmem:[%s8617_s23 + $0x8] sm:$0xff]  ;;  %v262_v3 = vld [vmem:[%s8617_s23 + $0x10] sm:$0xff]  ;;  %7352 = vset.pattern.permute.xlu1 %v7402_v13  ;;  %7350 = vset.pattern.permute.xlu0 %v8611_v32  ;;  %v840_v56 = vand.u32 4294901760, %v7597_v53  ;;  %v848_v62 = vsub.f32 %v7599_v54, %v847_v57 }
   0x9   :  { %v269_v4 = vand.u32 4294901760, %v260_v1  ;;  %v272_v5 = vand.u32 4294901760, %v261_v2  ;;  %v263_v6 = vld [vmem:[%s8617_s23 + $0x18] sm:$0xff]  ;;  %v275_v7 = vand.u32 4294901760, %v262_v3  ;;  %v340_v35 = vsub.f32 %v7542_v24, %v7549_v29  ;;  %134 = vperm.xlu0 %7350, %v7529_v18   ;;  %64 = vperm.xlu1 %7352, %v7578_v46  }
   0xa   :  { %v278_v10 = vand.u32 4294901760, %v263_v6  ;;  %v841_v61 = vsub.f32 %v7597_v53, %v840_v56 }
   0xb   :  { %v7520_v14 = vpack.c.bf16 %v272_v5, %v269_v4  ;;  %v7522_v15 = vsub.f32 %v260_v1, %v269_v4  ;;  %v356_v16 = vsub.f32 %v261_v2, %v272_v5  ;;  %v7531_v19 = vsub.f32 %v262_v3, %v275_v7 }
   0xc   :  { %v7533_v20 = vsub.f32 %v263_v6, %v278_v10  ;;  %v7538_v21 = vpack.c.bf16 %v278_v10, %v275_v7  ;;  %v7571_v42 = vand.u32 4294901760, %v340_v35  ;;  %v861_v1 = vand.u32 4294901760, %v7615_v59 }
   0xd   :  { %6830 = vmatpush3.bf16.msra.mxu0 %v7520_v14  ;;  %v350_v22 = vand.u32 4294901760, %v7522_v15  ;;  %v357_v23 = vand.u32 4294901760, %v356_v16  ;;  %v364_v25 = vand.u32 4294901760, %v7531_v19  ;;  %v7564_v37 = vpack.c.bf16 %v356_v16, %v7522_v15  ;;  %7354 = vset.pattern.permute.xlu0 %v7404_v50 }
   0xe   :  { %6831 = vmatprep.subr.bf16.mxu0 %v8612_v0  ;;  %v371_v26 = vand.u32 4294901760, %v7533_v20  ;;  %v7584_v47 = vpack.c.bf16 %v7533_v20, %v7531_v19  ;;  %154 = vperm.xlu0 %7354, %v7529_v18   ;;  %v7637_v2 = vpack.c.bf16 %v762_v45, %v759_v43  ;;  %v842_v3 = vand.u32 4294901760, %v841_v61 }
   0xf   :  { %v351_v27 = vsub.f32 %v7522_v15, %v350_v22  ;;  %v358_v28 = vsub.f32 %v356_v16, %v357_v23  ;;  %v365_v30 = vsub.f32 %v7531_v19, %v364_v25  ;;  %v7604_v55 = vpack.c.bf16 %v357_v23, %v350_v22  ;;  %7353 = vset.pattern.permute.xlu1 %v8611_v32 }
  0x10   :  { %v372_v31 = vsub.f32 %v7533_v20, %v371_v26  ;;  %v7619_v60 = vpack.c.bf16 %v371_v26, %v364_v25  ;;  %73 = vperm.xlu1 %7353, %v7578_v46   ;;  %v849_v4 = vand.u32 4294901760, %v848_v62  ;;  %v855_v5 = vsub.f32 %v7613_v58, %v854_v63  ;;  %v7730_v26 = vld [vmem:[%s8595_s7] sm:$0xff] }
  0x11   :  { %6833 = vmatpush3.bf16.msra.mxu0 %v7538_v21  ;;  %v352_v33 = vand.u32 4294901760, %v351_v27  ;;  %v359_v34 = vand.u32 4294901760, %v358_v28  ;;  %v366_v38 = vand.u32 4294901760, %v365_v30  ;;  %v862_v6 = vsub.f32 %v7615_v59, %v861_v1 }
  0x12   :  { %6840 = vmatprep.subr.bf16.mxu0 %v8612_v0  ;;  %v373_v39 = vand.u32 4294901760, %v372_v31  ;;  %93 = vperm.xlu0 %7354, %v7578_v46   ;;  %v7648_v7 = vpack.c.bf16 %v768_v52, %v765_v51  ;;  %v7657_v10 = vpack.c.bf16 %v849_v4, %v842_v3  ;;  %v856_v11 = vand.u32 4294901760, %v855_v5 }
  0x13   :  { %v7569_v41 = vpack.c.bf16 %v359_v34, %v352_v33  ;;  %v7405_v15 = vmov 4   ;;  %v7663_v16 = vpack.c.bf16 %v7599_v54, %v7597_v53  ;;  %v7676_v20 = vpack.c.bf16 %v7615_v59, %v7613_v58 }
  0x14   :  { %6033 = vmatmul.mubr.f32.vlgmr.msra.gmra.mrb[0].mxu0 %v7571_v42  ;;  %v7575_v44 = vpack.c.bf16 %v373_v39, %v366_v38  ;;  %7355 = vset.pattern.permute.xlu1 %v7401_v12  ;;  %v863_v12 = vand.u32 4294901760, %v862_v6  ;;  %v7690_v22 = vpack.c.bf16 %v847_v57, %v840_v56  ;;  %v7406_v23 = vmov 5  }
  0x15   :  { %6836 = vmatpush3.bf16.msra.mxu1 %v7569_v41  ;;  %6842 = vmatpush3.bf16.msra.mxu0 %v7564_v37 }
  0x16   :  { %6837 = vmatprep.subr.bf16.mxu1 %v8612_v0  ;;  %6843 = vmatprep.subr.bf16.mxu0 %v8612_v0  ;;  %v7670_v19 = vpack.c.bf16 %v863_v12, %v856_v11 }
  0x17   :  { %6054 = vmatprep.mubr.msk.f32.mxu0 %vm7399_vm1, %v8609_v8  ;;  %83 = vperm.xlu1 %7355, %v7578_v46  }
  0x18   :  { %7358 = vset.pattern.permute.xlu0 %v7405_v15 }
  0x19   :  { %6839 = vmatpush3.bf16.msra.mxu1 %v7575_v44  ;;  %6845 = vmatpush3.bf16.msra.mxu0 %v7584_v47 }
  0x1a   :  { %6846 = vmatprep.subr.bf16.mxu1 %v8612_v0  ;;  %6852 = vmatprep.subr.bf16.mxu0 %v8612_v0 }
  0x1b   :  { %103 = vperm.xlu0 %7358, %v7578_v46   ;;  %7356 = vset.pattern.permute.xlu1 %v7405_v15 }
  0x1c   :  { %6044 = vmatmul.mubr.f32.vlgmr.msra.gmra.mrb[0].mxu1 %v7524_v17  ;;  %6055 = vmatmul.mubr.f32.vlgmr.msra.gmra.mrb[2].mxu0 %v7542_v24 }
  0x1d   :  { %6848 = vmatpush3.bf16.msra.mxu1 %v7520_v14  ;;  %6854 = vmatpush3.bf16.msra.mxu0 %v7604_v55 }
  0x1e   :  { %6849 = vmatprep.subr.bf16.mxu1 %v8612_v0  ;;  %6855 = vmatprep.subr.bf16.mxu0 %v8612_v0 }
  0x1f   :  { %6065 = vmatprep.mubr.msk.f32.mxu1 %vm7399_vm1, %v8609_v8  ;;  %6076 = vmatprep.mubr.msk.f32.mxu0 %vm7399_vm1, %v8609_v8 }
  0x20   :  { %164 = vperm.xlu1 %7356, %v7529_v18   ;;  %7359 = vset.pattern.permute.xlu0 %v7402_v13  ;;  %v7698_v13 = vpack.c.bf16 %v861_v1, %v854_v63 }
  0x21   :  { %6851 = vmatpush3.bf16.msra.mxu1 %v7538_v21  ;;  %6857 = vmatpush3.bf16.msra.mxu0 %v7619_v60 }
  0x22   :  { %6858 = vmatprep.subr.bf16.mxu1 %v8612_v0  ;;  %6864 = vmatprep.subr.bf16.mxu0 %v8612_v0 }
  0x24   :  { %6066 = vmatmul.mubr.f32.vlgmr.msra.gmra.mrb[2].mxu1 %v7549_v29  ;;  %6077 = vmatmul.mubr.f32.vlgmr.msra.gmra.mrb[4].mxu0 %v7524_v17 }
  0x25   :  { %6860 = vmatpush3.bf16.msra.mxu1 %v7520_v14  ;;  %6866 = vmatpush3.bf16.msra.mxu0 %v7637_v2 }
  0x26   :  { %6861 = vmatprep.subr.bf16.mxu1 %v8612_v0  ;;  %6867 = vmatprep.subr.bf16.mxu0 %v8612_v0 }
  0x27   :  { %6087 = vmatprep.mubr.msk.f32.mxu1 %vm7399_vm1, %v8609_v8  ;;  %6098 = vmatprep.mubr.msk.f32.mxu0 %vm7399_vm1, %v8609_v8 }
  0x28   :  { %7357 = vset.pattern.permute.xlu1 %v7406_v23 }
  0x29   :  { %6863 = vmatpush3.bf16.msra.mxu1 %v7538_v21  ;;  %6869 = vmatpush3.bf16.msra.mxu0 %v7648_v7 }
  0x2a   :  { %6870 = vmatprep.subr.bf16.mxu1 %v8612_v0  ;;  %6876 = vmatprep.subr.bf16.mxu0 %v8612_v0 }
  0x2b   :  { %174 = vperm.xlu1 %7357, %v7529_v18  }
  0x2c   :  { %6088 = vmatmul.mubr.f32.vlgmr.msra.gmra.mrb[4].mxu1 %v7524_v17  ;;  %6099 = vmatmul.mubr.f32.vlgmr.msra.gmra.mrb[6].mxu0 %v7571_v42 }
  0x2d   :  { %6872 = vmatpush3.bf16.msra.mxu1 %v7657_v10  ;;  %6878 = vmatpush3.bf16.msra.mxu0 %v7663_v16 }
  0x2e   :  { %6873 = vmatprep.subr.bf16.mxu1 %v8612_v0  ;;  %6879 = vmatprep.subr.bf16.mxu0 %v8612_v0 }
  0x2f   :  { %6109 = vmatprep.mubr.msk.f32.mxu1 %vm7399_vm1, %v8609_v8  ;;  %6120 = vmatprep.mubr.msk.f32.mxu0 %vm7399_vm1, %v8609_v8 }
  0x30   :  { %113 = vperm.xlu1 %7357, %v7578_v46  }
  0x31   :  { %6875 = vmatpush3.bf16.msra.mxu1 %v7670_v19  ;;  %6881 = vmatpush3.bf16.msra.mxu0 %v7676_v20 }
  0x32   :  { %6882 = vmatprep.subr.bf16.mxu1 %v8612_v0  ;;  %6888 = vmatprep.subr.bf16.mxu0 %v8612_v0 }
  0x34   :  { %6110 = vmatmul.mubr.f32.vlgmr.msra.gmra.mrb[6].mxu1 %v7524_v17  ;;  %6121 = vmatmul.mubr.f32.vlgmr.msra.gmra.mrb[8].mxu0 %v7542_v24  ;;  %v67_v24 = vlaneseq }
  0x35   :  { %6884 = vmatpush3.bf16.msra.mxu1 %v7637_v2  ;;  %6890 = vmatpush3.bf16.msra.mxu0 %v7690_v22 }
  0x36   :  { %6885 = vmatprep.subr.bf16.mxu1 %v8612_v0  ;;  %6891 = vmatprep.subr.bf16.mxu0 %v8612_v0  ;;  %v7725_v25 = vshrl.u32 %v67_v24, 7 }
  0x37   :  { %6131 = vmatprep.mubr.msk.f32.mxu1 %vm7399_vm1, %v8609_v8  ;;  %6142 = vmatprep.mubr.msk.f32.mxu0 %vm7399_vm1, %v8609_v8 }
  0x38   :  { %7360 = vset.pattern.permute.xlu1 %v8611_v32  ;;  %v7733_v27 = vsub.s32 0, %v7725_v25  ;;  %v7736_v28 = vsub.s32 2, %v7725_v25  ;;  %v7741_v30 = vsub.s32 1, %v7725_v25  ;;  %v7748_v42 = vsub.s32 3, %v7725_v25 }
  0x39   :  { %6887 = vmatpush3.bf16.msra.mxu1 %v7648_v7  ;;  %6893 = vmatpush3.bf16.msra.mxu0 %v7698_v13  ;;  %v7753_v53 = vsub.s32 4, %v7725_v25  ;;  %v7758_v59 = vsub.s32 5, %v7725_v25 }
  0x3a   :  { %6894 = vmatprep.subr.bf16.mxu1 %v8612_v0  ;;  %6900 = vmatprep.subr.bf16.mxu0 %v8612_v0  ;;  %v210_v31 = vrot.slane %v7730_v26, %v7736_v28  ;;  %v204_v33 = vrot.slane %v7730_v26, %v7741_v30  ;;  %v216_v45 = vrot.slane %v7730_v26, %v7748_v42 }
  0x3b   :  { %8618 = vst [vmem:[#allocation2_spill] sm:$0xff] %v7753_v53  ;;  %v222_v54 = vrot.slane %v7730_v26, %v7753_v53  ;;  %8619 = vst [vmem:[#allocation3_spill] sm:$0xff] %v7758_v59  ;;  %v228_v61 = vrot.slane %v7730_v26, %v7758_v59 }
  0x3c   :  { %6132 = vmatmul.mubr.f32.vlgmr.msra.gmra.mrb[8].mxu1 %v7549_v29  ;;  %6143 = vmatmul.mubr.f32.vlgmr.msra.gmra.mrb[10].mxu0 %v7524_v17 }
  0x3d   :  { %6896 = vmatpush3.bf16.msra.mxu1 %v7637_v2  ;;  %6153 = vmatprep.mubr.msk.f32.mxu1 %vm7399_vm1, %v8609_v8 }
  0x3e   :  { %6897 = vmatprep.subr.bf16.mxu1 %v8612_v0  ;;  %6164 = vmatprep.mubr.msk.f32.mxu0 %vm7399_vm1, %v8609_v8 }
  0x41   :  { %6899 = vmatpush3.bf16.msra.mxu1 %v7648_v7 }
  0x42   :  { %6906 = vmatprep.subr.bf16.mxu1 %v8612_v0 }
  0x44   :  { %6154 = vmatmul.mubr.f32.vlgmr.msra.gmra.mrb[10].mxu1 %v7524_v17  ;;  %v199_v17 = vrot.slane %v7730_v26, %v7733_v27 }
  0x45   :  { %6175 = vmatprep.mubr.msk.f32.mxu1 %vm7399_vm1, %v8609_v8 }
  0x83   :  { %v126_v29 = vpop.permute.xlu0 %125  ;;  %v145_v35 = vpop.permute.xlu1 %144 }
  0x84   :  { %v200_v34 = vmul.f32 %v199_v17, %v126_v29  ;;  %v211_v38 = vmul.f32 %v210_v31, %v145_v35 }
  0x88   :  { %v135_v36 = vpop.permute.xlu0 %134  ;;  %v65_v50 = vpop.permute.xlu1 %64 }
  0x89   :  { %v205_v39 = vmul.f32 %v204_v33, %v135_v36 }
  0x8b   :  { %v206_v40 = vadd.f32 %v205_v39, %v200_v34  ;;  %v122_v34 = vld [vmem:[%s8596_s3] sm:$0x3f] }
  0x8d   :  { %v212_v43 = vadd.f32 %v211_v38, %v206_v40  ;;  %v155_v46 = vpop.permute.xlu0 %154  ;;  %v61_v40 = vld [vmem:[%s8597_s2] sm:$0x3f] }
  0x8e   :  { %v217_v48 = vmul.f32 %v216_v45, %v155_v46  ;;  %v140_v45 = vrot.slane %v122_v34, %v7741_v30 }
  0x8f   :  { %v74_v51 = vpop.permute.xlu1 %73 }
  0x90   :  { %v218_v49 = vadd.f32 %v217_v48, %v212_v43  ;;  %v131_v43 = vrot.slane %v122_v34, %v7733_v27  ;;  %v70_v48 = vrot.slane %v61_v40, %v7733_v27 }
  0x96   :  { %v84_v52 = vpop.permute.xlu1 %83 }
  0x9f   :  { %v165_v56 = vpop.permute.xlu1 %164 }
  0xa0   :  { %v223_v57 = vmul.f32 %v222_v54, %v165_v56 }
  0xa2   :  { %v224_v58 = vadd.f32 %v223_v57, %v218_v49  ;;  %v79_v49 = vrot.slane %v61_v40, %v7741_v30  ;;  %v150_v57 = vrot.slane %v122_v34, %v7736_v28 }
  0xaa   :  { %v7762_v62 = vpop.permute.xlu1 %174 }
  0xab   :  { %v229_v63 = vmul.f32 %v228_v61, %v7762_v62  ;;  %v141_v61 = vmul.f32 %v140_v45, %v135_v36 }
  0xad   :  { %v7765_v1 = vadd.f32 %v229_v63, %v224_v58  ;;  %v132_v58 = vmul.f32 %v131_v43, %v126_v29 }
  0xe7   :  { %v343_v3 = vpop.f32.mrb[0].mxu0 }
  0xe8   :  { %v6034_v4 = vpop.f32.mrb[1].mxu0 }
  0xef   :  { %v434_v5 = vpop.f32.mrb[0].mxu1  ;;  %v514_v12 = vpop.f32.mrb[2].mxu0 }
  0xf0   :  { %v435_v6 = vadd.f32 %v434_v5, %v343_v3  ;;  %v6045_v11 = vpop.f32.mrb[1].mxu1  ;;  %v6056_v15 = vpop.f32.mrb[3].mxu0 }
  0xf1   :  { %v80_v11 = vmul.f32 %v79_v49, %v74_v51  ;;  %v151_v15 = vmul.f32 %v150_v57, %v145_v35 }
  0xf2   :  { %v515_v23 = vadd.f32 %v514_v12, %v435_v6  ;;  %v71_v6 = vmul.f32 %v70_v48, %v65_v50  ;;  %v89_v12 = vrot.slane %v61_v40, %v7736_v28 }
  0xf7   :  { %v591_v24 = vpop.f32.mrb[2].mxu1  ;;  %v674_v33 = vpop.f32.mrb[4].mxu0 }
  0xf8   :  { %v592_v17 = vadd.f32 %v591_v24, %v515_v23  ;;  %v6067_v31 = vpop.f32.mrb[3].mxu1  ;;  %v6078_v38 = vpop.f32.mrb[5].mxu0  ;;  %v142_v23 = vadd.f32 %v141_v61, %v132_v58  ;;  %v160_v24 = vrot.slane %v122_v34, %v7748_v42 }
  0xf9   :  { %v81_v31 = vadd.f32 %v80_v11, %v71_v6  ;;  %v99_v38 = vrot.slane %v61_v40, %v7748_v42  ;;  %v114_v6 = vpop.permute.xlu1 %113 }
  0xfa   :  { %v675_v39 = vadd.f32 %v674_v33, %v592_v17  ;;  %v94_v17 = vpop.permute.xlu0 %93  ;;  %v90_v33 = vmul.f32 %v89_v12, %v84_v52  ;;  %v152_v29 = vadd.f32 %v151_v15, %v142_v23  ;;  %v161_v36 = vmul.f32 %v160_v24, %v155_v46 }
  0xfb   :  { %v100_v35 = vmul.f32 %v99_v38, %v94_v17  ;;  %v180_v52 = vrot.slane %v122_v34, %v7758_v59  ;;  %v119_v46 = vrot.slane %v61_v40, %v7758_v59 }
  0xfc   :  { %v91_v49 = vadd.f32 %v90_v33, %v81_v31  ;;  %v162_v57 = vadd.f32 %v161_v36, %v152_v29 }
  0xfd   :  { %v120_v33 = vmul.f32 %v119_v46, %v114_v6 }
  0xfe   :  { %v104_v61 = vpop.permute.xlu0 %103 }
  0xff   :  { %v749_v54 = vpop.f32.mrb[4].mxu1  ;;  %v833_v4 = vpop.f32.mrb[6].mxu0 }
 0x100   :  { %v750_v63 = vadd.f32 %v749_v54, %v675_v39  ;;  %v6089_v3 = vpop.f32.mrb[5].mxu1  ;;  %v6100_v5 = vpop.f32.mrb[7].mxu0  ;;  %v170_v39 = vrot.slane %v122_v34, %v7753_v53  ;;  %v109_v54 = vrot.slane %v61_v40, %v7753_v53  ;;  %v5647_v34 = vld [vmem:[%s8598_s6] ss:$0 sm:$0xff]  ;;  %s7407_s6 = smov 96  }
 0x101   :  { %v101_v3 = vadd.f32 %v100_v35, %v91_v49 }
 0x102   :  { %v171_v58 = vmul.f32 %v170_v39, %v165_v56  ;;  %v110_v5 = vmul.f32 %v109_v54, %v104_v61 }
 0x104   :  { %v111_v31 = vadd.f32 %v110_v5, %v101_v3 }
 0x106   :  { %v7789_v38 = vadd.f32 %v120_v33, %v111_v31 }
 0x107   :  { %v924_v8 = vpop.f32.mrb[6].mxu1  ;;  %v1004_v50 = vpop.f32.mrb[8].mxu0 }
 0x108   :  { %v925_v43 = vadd.f32 %v924_v8, %v833_v4  ;;  %v6111_v45 = vpop.f32.mrb[7].mxu1  ;;  %v6122_v51 = vpop.f32.mrb[9].mxu0  ;;  %v172_v8 = vadd.f32 %v171_v58, %v162_v57  ;;  %v181_v4 = vmul.f32 %v180_v52, %v7762_v62  ;;  %v7794_v62 = vsub.s32 6, %v7725_v25 }
 0x10a   :  { %v1005_v48 = vadd.f32 %v1004_v50, %v925_v43  ;;  %v182_v56 = vadd.f32 %v181_v4, %v172_v8  ;;  %v7797_v43 = vsub.s32 7, %v7725_v25  ;;  %v753_v50 = vadd.f32 %v750_v63, %v7789_v38 }
 0x10c   :  { %v7791_v29 = vadd.f32 %v5647_v34, %v182_v56 }
 0x10f   :  { %v1081_v11 = vpop.f32.mrb[8].mxu1  ;;  %v1164_v23 = vpop.f32.mrb[10].mxu0 }
 0x110   :  { %v1082_v12 = vadd.f32 %v1081_v11, %v1005_v48  ;;  %v6133_v15 = vpop.f32.mrb[9].mxu1  ;;  %v6144_v24 = vpop.f32.mrb[11].mxu0 }
 0x112   :  { %v1165_v17 = vadd.f32 %v1164_v23, %v1082_v12 }
 0x117   :  { %v1239_v40 = vpop.f32.mrb[10].mxu1 }
 0x118   :  { %v1240_v36 = vadd.f32 %v1239_v40, %v1165_v17  ;;  %v6155_v39 = vpop.f32.mrb[11].mxu1 }
 0x11a   :  { %v1243_v45 = vadd.f32 %v1240_v36, %v7791_v29 }
 0x11c   :  { %v1264_v51 = vrot.slane %v1243_v45, %v7741_v30  ;;  %v1247_v48 = vrot.slane %v1243_v45, %v7733_v27  ;;  %v1298_v49 = vrot.slane %v1243_v45, %v7748_v42  ;;  %v1281_v35 = vrot.slane %v1243_v45, %v7736_v28 }
 0x11d   :  { %v1315_v54 = vrot.slane %v1243_v45, %v7753_v53  ;;  %v1349_v57 = vrot.slane %v1243_v45, %v7794_v62  ;;  %v1332_v58 = vrot.slane %v1243_v45, %v7758_v59  ;;  %v1366_v25 = vrot.slane %v1243_v45, %v7797_v43 }
 0x11e   :  { %v1265_v52 = vadd.f32 %v1264_v51, %v753_v50  ;;  %v1248_v61 = vadd.f32 %v1247_v48, %v753_v50  ;;  %v1299_v3 = vadd.f32 %v1298_v49, %v753_v50  ;;  %v1282_v63 = vadd.f32 %v1281_v35, %v753_v50 }
 0x11f   :  { %v1316_v5 = vadd.f32 %v1315_v54, %v753_v50  ;;  %v1350_v46 = vadd.f32 %v1349_v57, %v753_v50  ;;  %v1333_v6 = vadd.f32 %v1332_v58, %v753_v50  ;;  %v1367_v11 = vadd.f32 %v1366_v25, %v753_v50 }
 0x120   :  { %v7809_v8 = vmax.f32 %v1265_v52, 0.0  ;;  %v7811_v4 = vmax.f32 %v1248_v61, 0.0  ;;  %v7813_v12 = vmax.f32 %v1299_v3, 0.0  ;;  %v7815_v15 = vmax.f32 %v1282_v63, 0.0 }
 0x121   :  { %v7817_v23 = vmax.f32 %v1316_v5, 0.0  ;;  %v7827_v56 = vmax.f32 %v1333_v6, 0.0  ;;  %v7831_v45 = vmax.f32 %v1350_v46, 0.0  ;;  %v7835_v48 = vmax.f32 %v1367_v11, 0.0 }
 0x122   :  { %v1267_v24 = vmul.f32 %v7809_v8, %v7809_v8  ;;  %v1250_v17 = vmul.f32 %v7811_v4, %v7811_v4  ;;  %v1301_v31 = vmul.f32 %v7813_v12, %v7813_v12  ;;  %v1284_v33 = vmul.f32 %v7815_v15, %v7815_v15 }
 0x123   :  { %v1318_v39 = vmul.f32 %v7817_v23, %v7817_v23  ;;  %v1335_v51 = vmul.f32 %v7827_v56, %v7827_v56  ;;  %v1352_v35 = vmul.f32 %v7831_v45, %v7831_v45  ;;  %v1369_v57 = vmul.f32 %v7835_v48, %v7835_v48 }
 0x124   :  { %v1268_v34 = vadd.f32 0.01, %v1267_v24  ;;  %v1251_v40 = vadd.f32 0.01, %v1250_v17  ;;  %v1285_v36 = vadd.f32 0.01, %v1284_v33 }
 0x125   :  { %v1302_v50 = vadd.f32 0.01, %v1301_v31  ;;  %v1319_v49 = vadd.f32 0.01, %v1318_v39  ;;  %v1336_v54 = vadd.f32 0.01, %v1335_v51 }
 0x126   :  { %7362 = vrcp.f32 %v1268_v34  ;;  %v1353_v58 = vadd.f32 0.01, %v1352_v35  ;;  %v1370_v25 = vadd.f32 0.01, %v1369_v57  ;;  %v55_v24 = vld [vmem:[%s8595_s7 + $0x8] sm:$0xff]  ;;  %v56_v17 = vld [vmem:[%s8595_s7 + $0x10] sm:$0xff] }
 0x127   :  { %7364 = vrcp.f32 %v1251_v40  ;;  %v1391_v33 = vand.u32 4294901760, %v55_v24  ;;  %v1394_v34 = vand.u32 4294901760, %v56_v17  ;;  %v57_v35 = vld [vmem:[%s8595_s7 + $0x18] sm:$0xff] }
 0x128   :  { %7366 = vrcp.f32 %v1285_v36  ;;  %v194_v36 = vrot.slane %v7529_v18, %v7748_v42 }
 0x129   :  { %7368 = vrcp.f32 %v1302_v50  ;;  %v1471_v50 = vsub.f32 %v55_v24, %v1391_v33  ;;  %v1478_v51 = vsub.f32 %v56_v17, %v1394_v34  ;;  %v7863_v0 = vpack.c.bf16 %v1394_v34, %v1391_v33 }
 0x12a   :  { %7370 = vrcp.f32 %v1319_v49 }
 0x12b   :  { %7372 = vrcp.f32 %v1336_v54  ;;  %v58_v54 = vld [vmem:[%s8595_s7 + $0x20] sm:$0xff]  ;;  %6902 = vmatpush3.bf16.msra.mxu0 %v7863_v0 }
 0x12c   :  { %7374 = vrcp.f32 %v1353_v58  ;;  %v1472_v58 = vand.u32 4294901760, %v1471_v50 }
 0x12d   :  { %7376 = vrcp.f32 %v1370_v25  ;;  %v1479_v25 = vand.u32 4294901760, %v1478_v51 }
 0x130   :  { %v7363_v52 = vpop.eup %7362 }
 0x131   :  { %v7365_v61 = vpop.eup %7364  ;;  %1272 = vrot.lane.b32.xlu0 %v7363_v52, %s7407_s6 }
 0x132   :  { %1255 = vrot.lane.b32.xlu1 %v7365_v61, %s7407_s6  ;;  %v1277_v3 = vadd.f32 %v7365_v61, %v7363_v52  ;;  %v7367_v63 = vpop.eup %7366  ;;  %v1397_v52 = vand.u32 4294901760, %v57_v35 }
 0x133   :  { %v7369_v5 = vpop.eup %7368 }
 0x134   :  { %v1294_v46 = vadd.f32 %v7367_v63, %v1277_v3  ;;  %v7371_v11 = vpop.eup %7370  ;;  %v195_v3 = vsub.f32 %v7529_v18, %v194_v36  ;;  %v8620_v36 = vmov 0.0|0.0  }
 0x135   :  { %1306 = vrot.lane.b32.xlu0 %v7369_v5, %s7407_s6  ;;  %v7373_v40 = vpop.eup %7372  ;;  %6903 = vmatprep.subr.bf16.mxu0 %v8620_v36 }
 0x136   :  { %1289 = vrot.lane.b32.xlu1 %v7367_v63, %s7407_s6  ;;  %v1311_v6 = vadd.f32 %v7369_v5, %v1294_v46  ;;  %v7375_v49 = vpop.eup %7374  ;;  %v1400_v63 = vand.u32 4294901760, %v58_v54  ;;  %v1473_v46 = vsub.f32 %v1471_v50, %v1472_v58 }
 0x137   :  { %v7377_v61 = vpop.eup %7376 }
 0x138   :  { %v1328_v31 = vadd.f32 %v7371_v11, %v1311_v6  ;;  %v1480_v6 = vsub.f32 %v1478_v51, %v1479_v25  ;;  %v1492_v24 = vsub.f32 %v58_v54, %v1400_v63  ;;  %v1474_v17 = vand.u32 4294901760, %v1473_v46 }
 0x139   :  { %1323 = vrot.lane.b32.xlu0 %v7371_v11, %s7407_s6  ;;  %v1485_v11 = vsub.f32 %v57_v35, %v1397_v52  ;;  %v8621_v54 = vmov 1   ;;  %v7876_v34 = vpack.c.bf16 %v1400_v63, %v1397_v52 }
 0x13a   :  { %v1345_v39 = vadd.f32 %v7373_v40, %v1328_v31  ;;  %v1481_v31 = vand.u32 4294901760, %v1480_v6 }
 0x13b   :  { %v1486_v32 = vand.u32 4294901760, %v1485_v11  ;;  %6905 = vmatpush3.bf16.msra.mxu0 %v7876_v34 }
 0x13c   :  { %v1362_v57 = vadd.f32 %v7375_v49, %v1345_v39  ;;  %v1493_v39 = vand.u32 4294901760, %v1492_v24  ;;  %v7865_v59 = vpack.c.bf16 %v1481_v31, %v1474_v17  ;;  %6912 = vmatprep.subr.bf16.mxu0 %v8620_v36 }
 0x13d   :  { %1357 = vrot.lane.b32.xlu0 %v7375_v49, %s7407_s6  ;;  %v1487_v49 = vsub.f32 %v1485_v11, %v1486_v32 }
 0x13e   :  { %v1379_v5 = vadd.f32 %v7377_v61, %v1362_v57  ;;  %v1494_v53 = vsub.f32 %v1492_v24, %v1493_v39  ;;  %6908 = vmatpush3.bf16.msra.mxu1 %v7865_v59  ;;  %v7886_v57 = vpack.c.bf16 %v1479_v25, %v1472_v58 }
 0x13f   :  { %v1488_v18 = vand.u32 4294901760, %v1487_v49  ;;  %6909 = vmatprep.subr.bf16.mxu1 %v8620_v36 }
 0x140   :  { %1381 = vrot.lane.b32.xlu1 %v1379_v5, %s7407_s6  ;;  %v1495_v35 = vand.u32 4294901760, %v1494_v53  ;;  %v7882_v53 = vpack.c.bf16 %v1478_v51, %v1471_v50  ;;  %v7888_v5 = vpack.c.bf16 %v1493_v39, %v1486_v32 }
 0x141   :  { %233 = vperm.xlu0 %7359, %v195_v3  }
 0x142   :  { %v7873_v33 = vpack.c.bf16 %v1495_v35, %v1488_v18 }
 0x144   :  { %1340 = vrot.lane.b32.xlu1 %v7373_v40, %s7407_s6  ;;  %6911 = vmatpush3.bf16.msra.mxu1 %v7873_v33  ;;  %v7884_v40 = vpack.c.bf16 %v1492_v24, %v1485_v11 }
 0x145   :  { %7361 = vset.pattern.permute.xlu0 %v8621_v54  ;;  %6918 = vmatprep.subr.bf16.mxu1 %v8620_v36 }
 0x148   :  { %1374 = vrot.lane.b32.xlu1 %v7377_v61, %s7407_s6 }
 0x14c   :  { %242 = vperm.xlu1 %7360, %v195_v3  }
 0x1a3   :  { %v1273_v61 = vpop.permute.xlu0 %1272 }
 0x1a4   :  { %v1256_v52 = vpop.permute.xlu1 %1255  ;;  %v1275_v46 = vmul.f32 %v1273_v61, %v7809_v8 }
 0x1a5   :  { %v1258_v6 = vmul.f32 %v1256_v52, %v7811_v4 }
 0x1a7   :  { %v1307_v17 = vpop.permute.xlu0 %1306  ;;  %v1276_v49 = vadd.f32 %v1275_v46, %v1258_v6 }
 0x1a8   :  { %v1290_v63 = vpop.permute.xlu1 %1289  ;;  %v1309_v51 = vmul.f32 %v1307_v17, %v7813_v12 }
 0x1a9   :  { %v1292_v31 = vmul.f32 %v1290_v63, %v7815_v15 }
 0x1ab   :  { %v1293_v3 = vadd.f32 %v1292_v31, %v1276_v49  ;;  %v1324_v50 = vpop.permute.xlu0 %1323  ;;  %v1878_v31 = vld [vmem:[%s8599_s9 + $0x8] sm:$0xff]  ;;  %v1879_v49 = vld [vmem:[%s8599_s9 + $0x10] sm:$0xff] }
 0x1ac   :  { %v1326_v32 = vmul.f32 %v1324_v50, %v7817_v23  ;;  %v1895_v50 = vand.u32 4294901760, %v1878_v31 }
 0x1ad   :  { %v1310_v58 = vadd.f32 %v1309_v51, %v1293_v3  ;;  %v1880_v51 = vld [vmem:[%s8599_s9 + $0x18] sm:$0xff] }
 0x1af   :  { %v1358_v25 = vpop.permute.xlu0 %1357  ;;  %v1327_v39 = vadd.f32 %v1326_v32, %v1310_v58  ;;  %v1901_v58 = vand.u32 4294901760, %v1880_v51 }
 0x1b0   :  { %v1360_v4 = vmul.f32 %v1358_v25, %v7831_v45 }
 0x1b2   :  { %v1382_v11 = vpop.permute.xlu1 %1381 }
 0x1b3   :  { %7378 = vrcp.f32 %v1382_v11  ;;  %v1898_v11 = vand.u32 4294901760, %v1879_v49 }
 0x1b6   :  { %v1341_v24 = vpop.permute.xlu1 %1340 }
 0x1b7   :  { %v1343_v8 = vmul.f32 %v1341_v24, %v7827_v56  ;;  %v8622_v56 = vmov 0.0   ;;  %v1979_v24 = vsub.f32 %v1878_v31, %v1895_v50 }
 0x1b9   :  { %v1344_v18 = vadd.f32 %v1343_v8, %v1327_v39  ;;  %v7947_v39 = vpack.c.bf16 %v1901_v58, %v1898_v11 }
 0x1ba   :  { %v1375_v35 = vpop.permute.xlu1 %1374 }
 0x1bb   :  { %v1361_v15 = vadd.f32 %v1360_v4, %v1344_v18  ;;  %v1377_v54 = vmul.f32 %v1375_v35, %v7835_v48  ;;  %v1980_v4 = vand.u32 4294901760, %v1979_v24 }
 0x1bd   :  { %v7379_v61 = vpop.eup %7378  ;;  %v1378_v52 = vadd.f32 %v1377_v54, %v1361_v15  ;;  %v1981_v35 = vsub.f32 %v1979_v24, %v1980_v4  ;;  %v1986_v15 = vsub.f32 %v1879_v49, %v1898_v11  ;;  %v1993_v54 = vsub.f32 %v1880_v51, %v1901_v58 }
 0x1bf   :  { %v1385_v12 = vmul.f32 %v7379_v61, %v1378_v52  ;;  %v1982_v52 = vand.u32 4294901760, %v1981_v35  ;;  %v7958_v31 = vpack.c.bf16 %v1993_v54, %v1986_v15 }
 0x1c1   :  { %v1386_v63 = vadd.f32 %v1385_v12, %v7512_v9  ;;  %v1877_v9 = vld [vmem:[%s8599_s9] sm:$0xff]  ;;  %v1987_v12 = vand.u32 4294901760, %v1986_v15 }
 0x1c2   :  { %v1892_v3 = vand.u32 4294901760, %v1877_v9 }
 0x1c3   :  { %v1388_v23 = vsel %vm264_vm0, %v1386_v63, 0  ;;  %v1994_v63 = vand.u32 4294901760, %v1993_v54 }
 0x1c4   :  { %v1459_v46 = vand.u32 4294901760, %v1388_v23  ;;  %v7944_v32 = vpack.c.bf16 %v1895_v50, %v1892_v3  ;;  %v1972_v25 = vsub.f32 %v1877_v9, %v1892_v3 }
 0x1c5   :  { %v7962_v3 = vpack.c.bf16 %v1994_v63, %v1987_v12 }
 0x1c6   :  { %v1460_v6 = vsub.f32 %v1388_v23, %v1459_v46  ;;  %6176 = vmatmul.mubr.f32.vlgmr.msra.gmra.mrb[12].mxu1 %v1459_v46  ;;  %v1973_v8 = vand.u32 4294901760, %v1972_v25  ;;  %v7956_v9 = vpack.c.bf16 %v1979_v24, %v1972_v25  ;;  %v234_v24 = vpop.permute.xlu0 %233 }
 0x1c7   :  { %6920 = vmatpush3.bf16.msra.mxu1 %v7863_v0  ;;  %6197 = vmatprep.mubr.msk.f32.mxu1 %vm7399_vm1, %v8622_v56 }
 0x1c8   :  { %6921 = vmatprep.subr.bf16.mxu1 %v8620_v36  ;;  %v1461_v45 = vand.u32 4294901760, %v1460_v6  ;;  %v1974_v18 = vsub.f32 %v1972_v25, %v1973_v8  ;;  %v7960_v49 = vpack.c.bf16 %v1980_v4, %v1973_v8  ;;  %v248_v25 = vrot.slane %v7730_v26, %v7797_v43 }
 0x1ca   :  { %v1462_v17 = vsub.f32 %v1460_v6, %v1461_v45  ;;  %v1975_v61 = vand.u32 4294901760, %v1974_v18 }
 0x1cb   :  { %6923 = vmatpush3.bf16.msra.mxu1 %v7876_v34 }
 0x1cc   :  { %6930 = vmatprep.subr.bf16.mxu1 %v8620_v36  ;;  %v1463_v48 = vand.u32 4294901760, %v1462_v17  ;;  %v7952_v23 = vpack.c.bf16 %v1982_v52, %v1975_v61  ;;  %v239_v52 = vrot.slane %v7730_v26, %v7794_v62 }
 0x1ce   :  { %6198 = vmatmul.mubr.f32.vlgmr.msra.gmra.mrb[14].mxu1 %v1461_v45  ;;  %6165 = vmatmul.mubr.f32.vlgmr.msra.gmra.mrb[12].mxu0 %v1463_v48 }
 0x1cf   :  { %6914 = vmatpush3.bf16.msra.mxu0 %v7882_v53  ;;  %6932 = vmatpush3.bf16.msra.mxu1 %v7863_v0 }
 0x1d0   :  { %6915 = vmatprep.subr.bf16.mxu0 %v8620_v36  ;;  %6933 = vmatprep.subr.bf16.mxu1 %v8620_v36 }
 0x1d1   :  { %6186 = vmatprep.mubr.msk.f32.mxu0 %vm7399_vm1, %v8622_v56  ;;  %6219 = vmatprep.mubr.msk.f32.mxu1 %vm7399_vm1, %v8622_v56 }
 0x1d3   :  { %6917 = vmatpush3.bf16.msra.mxu0 %v7884_v40  ;;  %6935 = vmatpush3.bf16.msra.mxu1 %v7876_v34 }
 0x1d4   :  { %6924 = vmatprep.subr.bf16.mxu0 %v8620_v36  ;;  %6972 = vmatprep.subr.bf16.mxu1 %v8620_v36 }
 0x1d6   :  { %6187 = vmatmul.mubr.f32.vlgmr.msra.gmra.mrb[14].mxu0 %v1460_v6  ;;  %6220 = vmatmul.mubr.f32.vlgmr.msra.gmra.mrb[16].mxu1 %v1459_v46  ;;  %v1995_v6 = vsub.f32 %v1993_v54, %v1994_v63  ;;  %v240_v54 = vmul.f32 %v239_v52, %v234_v24 }
 0x1d7   :  { %6926 = vmatpush3.bf16.msra.mxu0 %v7886_v57  ;;  %6208 = vmatprep.mubr.msk.f32.mxu0 %vm7399_vm1, %v8622_v56 }
 0x1d8   :  { %6927 = vmatprep.subr.bf16.mxu0 %v8620_v36  ;;  %6974 = vmatpush3.bf16.msra.mxu1 %v7520_v14  ;;  %v1996_v17 = vand.u32 4294901760, %v1995_v6 }
 0x1d9   :  { %6975 = vmatprep.subr.bf16.mxu1 %v8620_v36  ;;  %6296 = vmatprep.mubr.msk.f32.mxu1 %vm7399_vm1, %v8622_v56 }
 0x1db   :  { %6929 = vmatpush3.bf16.msra.mxu0 %v7888_v5 }
 0x1dc   :  { %6936 = vmatprep.subr.bf16.mxu0 %v8620_v36  ;;  %6977 = vmatpush3.bf16.msra.mxu1 %v7538_v21 }
 0x1dd   :  { %6978 = vmatprep.subr.bf16.mxu1 %v8620_v36 }
 0x1de   :  { %6209 = vmatmul.mubr.f32.vlgmr.msra.gmra.mrb[16].mxu0 %v1459_v46  ;;  %v1988_v46 = vsub.f32 %v1986_v15, %v1987_v12  ;;  %v243_v15 = vpop.permute.xlu1 %242 }
 0x1df   :  { %6230 = vmatprep.mubr.msk.f32.mxu0 %vm7399_vm1, %v8622_v56  ;;  %6938 = vmatpush3.bf16.msra.mxu0 %v7944_v32  ;;  %v249_v8 = vmul.f32 %v248_v25, %v243_v15 }
 0x1e0   :  { %6939 = vmatprep.subr.bf16.mxu0 %v8620_v36  ;;  %v1989_v45 = vand.u32 4294901760, %v1988_v46 }
 0x1e2   :  { %v7954_v48 = vpack.c.bf16 %v1996_v17, %v1989_v45  ;;  %v250_v45 = vadd.f32 %v249_v8, %v240_v54 }
 0x1e3   :  { %6941 = vmatpush3.bf16.msra.mxu0 %v7947_v39 }
 0x1e4   :  { %6942 = vmatprep.subr.bf16.mxu0 %v8620_v36 }
 0x299   :  { %v1556_v50 = vpop.f32.mrb[12].mxu1 }
 0x29a   :  { %v6177_v51 = vpop.f32.mrb[13].mxu1 }
 0x29b   :  { %v5648_v51 = vld [vmem:[%s8600_s8] ss:$0 sm:$0xff] }
 0x2a1   :  { %v1713_v11 = vpop.f32.mrb[14].mxu1  ;;  %v1465_v58 = vpop.f32.mrb[12].mxu0 }
 0x2a2   :  { %v1557_v18 = vadd.f32 %v1556_v50, %v1465_v58  ;;  %v6199_v35 = vpop.f32.mrb[15].mxu1  ;;  %v6166_v61 = vpop.f32.mrb[13].mxu0  ;;  %v251_v50 = vadd.f32 %v250_v45, %v7765_v1 }
 0x2a4   :  { %v7972_v61 = vadd.f32 %v5648_v51, %v251_v50 }
 0x2a9   :  { %v1636_v4 = vpop.f32.mrb[14].mxu0  ;;  %v1871_v12 = vpop.f32.mrb[16].mxu1 }
 0x2aa   :  { %v1637_v63 = vadd.f32 %v1636_v4, %v1557_v18  ;;  %v6188_v46 = vpop.f32.mrb[15].mxu0  ;;  %v6221_v6 = vpop.f32.mrb[17].mxu1  ;;  %v8015_v4 = vld [vmem:[%s8601_s10] ss:$0 sm:$0xff] }
 0x2ac   :  { %v1714_v17 = vadd.f32 %v1713_v11, %v1637_v63 }
 0x2b1   :  { %v1796_v58 = vpop.f32.mrb[16].mxu0 }
 0x2b2   :  { %v1797_v35 = vadd.f32 %v1796_v58, %v1714_v17  ;;  %v6210_v26 = vpop.f32.mrb[17].mxu0 }
 0x2b4   :  { %v1872_v52 = vadd.f32 %v1871_v12, %v1797_v35 }
 0x2b6   :  { %v1875_v25 = vadd.f32 %v1872_v52, %v7972_v61 }
 0x2b8   :  { %v1876_v24 = vmax.f32 %v1875_v25, 0.0 }
 0x2ba   :  { %v1889_v18 = vsel %vm264_vm0, %v1876_v24, 0 }
 0x2bb   :  { %v1960_v15 = vand.u32 4294901760, %v1889_v18 }
 0x2bd   :  { %v1961_v54 = vsub.f32 %v1889_v18, %v1960_v15 }
 0x2bf   :  { %v1962_v11 = vand.u32 4294901760, %v1961_v54 }
 0x2c1   :  { %v1963_v8 = vsub.f32 %v1961_v54, %v1962_v11 }
 0x2c3   :  { %v1964_v1 = vand.u32 4294901760, %v1963_v8 }
 0x2c5   :  { %6231 = vmatmul.mubr.f32.vlgmr.msra.gmra.mrb[18].mxu0 %v1964_v1 }
 0x2c6   :  { %6944 = vmatpush3.bf16.msra.mxu0 %v7952_v23  ;;  %6241 = vmatprep.mubr.msk.f32.mxu0 %vm7399_vm1, %v8622_v56 }
 0x2c7   :  { %6945 = vmatprep.subr.bf16.mxu0 %v8620_v36 }
 0x2ca   :  { %6947 = vmatpush3.bf16.msra.mxu0 %v7954_v48 }
 0x2cb   :  { %6948 = vmatprep.subr.bf16.mxu0 %v8620_v36 }
 0x2cd   :  { %6242 = vmatmul.mubr.f32.vlgmr.msra.gmra.mrb[18].mxu0 %v1960_v15 }
 0x2ce   :  { %6950 = vmatpush3.bf16.msra.mxu0 %v7956_v9  ;;  %6252 = vmatprep.mubr.msk.f32.mxu0 %vm7399_vm1, %v8622_v56 }
 0x2cf   :  { %6951 = vmatprep.subr.bf16.mxu0 %v8620_v36 }
 0x2d2   :  { %6953 = vmatpush3.bf16.msra.mxu0 %v7958_v31 }
 0x2d3   :  { %6954 = vmatprep.subr.bf16.mxu0 %v8620_v36 }
 0x2d5   :  { %6253 = vmatmul.mubr.f32.vlgmr.msra.gmra.mrb[18].mxu0 %v1961_v54 }
 0x2d6   :  { %6956 = vmatpush3.bf16.msra.mxu0 %v7944_v32  ;;  %6263 = vmatprep.mubr.msk.f32.mxu0 %vm7399_vm1, %v8622_v56 }
 0x2d7   :  { %6957 = vmatprep.subr.bf16.mxu0 %v8620_v36 }
 0x2da   :  { %6959 = vmatpush3.bf16.msra.mxu0 %v7947_v39 }
 0x2db   :  { %6960 = vmatprep.subr.bf16.mxu0 %v8620_v36 }
 0x2dd   :  { %6264 = vmatmul.mubr.f32.vlgmr.msra.gmra.mrb[18].mxu0 %v1962_v11 }
 0x2de   :  { %6962 = vmatpush3.bf16.msra.mxu0 %v7960_v49  ;;  %6274 = vmatprep.mubr.msk.f32.mxu0 %vm7399_vm1, %v8622_v56 }
 0x2df   :  { %6963 = vmatprep.subr.bf16.mxu0 %v8620_v36 }
 0x2e2   :  { %6965 = vmatpush3.bf16.msra.mxu0 %v7962_v3 }
 0x2e3   :  { %6966 = vmatprep.subr.bf16.mxu0 %v8620_v36 }
 0x2e5   :  { %6275 = vmatmul.mubr.f32.vlgmr.msra.gmra.mrb[18].mxu0 %v1960_v15 }
 0x2e6   :  { %6968 = vmatpush3.bf16.msra.mxu0 %v7944_v32  ;;  %6285 = vmatprep.mubr.msk.f32.mxu0 %vm7399_vm1, %v8622_v56 }
 0x2e7   :  { %6969 = vmatprep.subr.bf16.mxu0 %v8620_v36 }
 0x2ea   :  { %6971 = vmatpush3.bf16.msra.mxu0 %v7947_v39 }
 0x2eb   :  { %7008 = vmatprep.subr.bf16.mxu0 %v8620_v36 }
 0x2ed   :  { %6286 = vmatmul.mubr.f32.vlgmr.msra.gmra.mrb[18].mxu0 %v1960_v15 }
 0x2ee   :  { %7010 = vmatpush3.bf16.msra.mxu0 %v7637_v2  ;;  %6362 = vmatprep.mubr.msk.f32.mxu0 %vm7399_vm1, %v8622_v56 }
 0x2ef   :  { %7011 = vmatprep.subr.bf16.mxu0 %v8620_v36 }
 0x2f2   :  { %7013 = vmatpush3.bf16.msra.mxu0 %v7648_v7 }
 0x2f3   :  { %7020 = vmatprep.subr.bf16.mxu0 %v8620_v36 }
 0x3c0   :  { %v2372_v12 = vpop.f32.mrb[18].mxu0 }
 0x3c1   :  { %v8018_v63 = vadd.f32 %v8015_v4, %v2372_v12  ;;  %v6287_v46 = vpop.f32.mrb[19].mxu0 }
 0x3c3   :  { %v2377_v6 = vsel %vm264_vm0, %v8018_v63, 0 }
 0x3c4   :  { %v8022_v45 = vand.u32 4294901760, %v2377_v6 }
 0x3c6   :  { %v2449_v17 = vsub.f32 %v2377_v6, %v8022_v45 }
 0x3c8   :  { %v2450_v50 = vand.u32 4294901760, %v2449_v17 }
 0x3ca   :  { %v2451_v51 = vsub.f32 %v2449_v17, %v2450_v50 }
 0x3cc   :  { %v2452_v58 = vand.u32 4294901760, %v2451_v51 }
 0x3ce   :  { %6297 = vmatmul.mubr.f32.vlgmr.msra.gmra.mrb[18].mxu1 %v2452_v58  ;;  %6363 = vmatmul.mubr.f32.vlgmr.msra.gmra.mrb[20].mxu0 %v2452_v58 }
 0x3cf   :  { %6980 = vmatpush3.bf16.msra.mxu1 %v7569_v41  ;;  %7022 = vmatpush3.bf16.msra.mxu0 %v7663_v16 }
 0x3d0   :  { %6981 = vmatprep.subr.bf16.mxu1 %v8620_v36  ;;  %7023 = vmatprep.subr.bf16.mxu0 %v8620_v36 }
 0x3d1   :  { %6307 = vmatprep.mubr.msk.f32.mxu1 %vm7399_vm1, %v8622_v56  ;;  %6384 = vmatprep.mubr.msk.f32.mxu0 %vm7399_vm1, %v8622_v56 }
 0x3d3   :  { %6983 = vmatpush3.bf16.msra.mxu1 %v7575_v44  ;;  %7025 = vmatpush3.bf16.msra.mxu0 %v7676_v20 }
 0x3d4   :  { %6984 = vmatprep.subr.bf16.mxu1 %v8620_v36  ;;  %7032 = vmatprep.subr.bf16.mxu0 %v8620_v36 }
 0x3d6   :  { %6308 = vmatmul.mubr.f32.vlgmr.msra.gmra.mrb[20].mxu1 %v8022_v45  ;;  %6385 = vmatmul.mubr.f32.vlgmr.msra.gmra.mrb[22].mxu0 %v2449_v17 }
 0x3d7   :  { %6986 = vmatpush3.bf16.msra.mxu1 %v7564_v37  ;;  %7034 = vmatpush3.bf16.msra.mxu0 %v7690_v22 }
 0x3d8   :  { %6987 = vmatprep.subr.bf16.mxu1 %v8620_v36  ;;  %7035 = vmatprep.subr.bf16.mxu0 %v8620_v36 }
 0x3d9   :  { %6318 = vmatprep.mubr.msk.f32.mxu1 %vm7399_vm1, %v8622_v56  ;;  %6406 = vmatprep.mubr.msk.f32.mxu0 %vm7399_vm1, %v8622_v56 }
 0x3db   :  { %6989 = vmatpush3.bf16.msra.mxu1 %v7584_v47  ;;  %7037 = vmatpush3.bf16.msra.mxu0 %v7698_v13 }
 0x3dc   :  { %6990 = vmatprep.subr.bf16.mxu1 %v8620_v36  ;;  %7044 = vmatprep.subr.bf16.mxu0 %v8620_v36 }
 0x3de   :  { %6319 = vmatmul.mubr.f32.vlgmr.msra.gmra.mrb[22].mxu1 %v2449_v17  ;;  %6407 = vmatmul.mubr.f32.vlgmr.msra.gmra.mrb[24].mxu0 %v8022_v45 }
 0x3df   :  { %6992 = vmatpush3.bf16.msra.mxu1 %v7520_v14  ;;  %6329 = vmatprep.mubr.msk.f32.mxu1 %vm7399_vm1, %v8622_v56 }
 0x3e0   :  { %6993 = vmatprep.subr.bf16.mxu1 %v8620_v36  ;;  %7046 = vmatpush3.bf16.msra.mxu0 %v7863_v0 }
 0x3e1   :  { %7047 = vmatprep.subr.bf16.mxu0 %v8620_v36  ;;  %6428 = vmatprep.mubr.msk.f32.mxu0 %vm7399_vm1, %v8622_v56 }
 0x3e3   :  { %6995 = vmatpush3.bf16.msra.mxu1 %v7538_v21 }
 0x3e4   :  { %6996 = vmatprep.subr.bf16.mxu1 %v8620_v36  ;;  %7049 = vmatpush3.bf16.msra.mxu0 %v7876_v34 }
 0x3e5   :  { %7056 = vmatprep.subr.bf16.mxu0 %v8620_v36 }
 0x3e6   :  { %6330 = vmatmul.mubr.f32.vlgmr.msra.gmra.mrb[24].mxu1 %v2450_v50 }
 0x3e7   :  { %6998 = vmatpush3.bf16.msra.mxu1 %v7604_v55  ;;  %6340 = vmatprep.mubr.msk.f32.mxu1 %vm7399_vm1, %v8622_v56 }
 0x3e8   :  { %6999 = vmatprep.subr.bf16.mxu1 %v8620_v36 }
 0x3eb   :  { %7001 = vmatpush3.bf16.msra.mxu1 %v7619_v60 }
 0x3ec   :  { %7002 = vmatprep.subr.bf16.mxu1 %v8620_v36 }
 0x3ee   :  { %6341 = vmatmul.mubr.f32.vlgmr.msra.gmra.mrb[26].mxu1 %v8022_v45 }
 0x3ef   :  { %7004 = vmatpush3.bf16.msra.mxu1 %v7520_v14  ;;  %6351 = vmatprep.mubr.msk.f32.mxu1 %vm7399_vm1, %v8622_v56 }
 0x3f0   :  { %7005 = vmatprep.subr.bf16.mxu1 %v8620_v36 }
 0x3f3   :  { %7007 = vmatpush3.bf16.msra.mxu1 %v7538_v21 }
 0x3f4   :  { %7014 = vmatprep.subr.bf16.mxu1 %v8620_v36 }
 0x3f6   :  { %6352 = vmatmul.mubr.f32.vlgmr.msra.gmra.mrb[28].mxu1 %v8022_v45 }
 0x3f7   :  { %7016 = vmatpush3.bf16.msra.mxu1 %v7657_v10  ;;  %6373 = vmatprep.mubr.msk.f32.mxu1 %vm7399_vm1, %v8622_v56 }
 0x3f8   :  { %7017 = vmatprep.subr.bf16.mxu1 %v8620_v36 }
 0x3fb   :  { %7019 = vmatpush3.bf16.msra.mxu1 %v7670_v19 }
 0x3fc   :  { %7026 = vmatprep.subr.bf16.mxu1 %v8620_v36 }
 0x3fe   :  { %6374 = vmatmul.mubr.f32.vlgmr.msra.gmra.mrb[30].mxu1 %v8022_v45 }
 0x3ff   :  { %7028 = vmatpush3.bf16.msra.mxu1 %v7637_v2  ;;  %6395 = vmatprep.mubr.msk.f32.mxu1 %vm7399_vm1, %v8622_v56 }
 0x400   :  { %7029 = vmatprep.subr.bf16.mxu1 %v8620_v36 }
 0x403   :  { %7031 = vmatpush3.bf16.msra.mxu1 %v7648_v7 }
 0x404   :  { %7038 = vmatprep.subr.bf16.mxu1 %v8620_v36 }
 0x406   :  { %6396 = vmatmul.mubr.f32.vlgmr.msra.gmra.mrb[32].mxu1 %v2450_v50 }
 0x407   :  { %7040 = vmatpush3.bf16.msra.mxu1 %v7637_v2  ;;  %6417 = vmatprep.mubr.msk.f32.mxu1 %vm7399_vm1, %v8622_v56 }
 0x408   :  { %7041 = vmatprep.subr.bf16.mxu1 %v8620_v36 }
 0x40b   :  { %7043 = vmatpush3.bf16.msra.mxu1 %v7648_v7 }
 0x40c   :  { %7050 = vmatprep.subr.bf16.mxu1 %v8620_v36 }
 0x40e   :  { %6418 = vmatmul.mubr.f32.vlgmr.msra.gmra.mrb[34].mxu1 %v8022_v45 }
 0x40f   :  { %7052 = vmatpush3.bf16.msra.mxu1 %v7865_v59  ;;  %6439 = vmatprep.mubr.msk.f32.mxu1 %vm7399_vm1, %v8622_v56 }
 0x410   :  { %7053 = vmatprep.subr.bf16.mxu1 %v8620_v36 }
 0x413   :  { %7055 = vmatpush3.bf16.msra.mxu1 %v7873_v33 }
 0x414   :  { %7062 = vmatprep.subr.bf16.mxu1 %v8620_v36 }
 0x4a1   :  { %v2454_v14 = vpop.f32.mrb[18].mxu1  ;;  %v2940_v21 = vpop.f32.mrb[20].mxu0 }
 0x4a2   :  { %v6298_v37 = vpop.f32.mrb[19].mxu1  ;;  %v6364_v41 = vpop.f32.mrb[21].mxu0 }
 0x4a3   :  { %v8623_v41 = vld [vmem:[#allocation2_spill] sm:$0xff] }
 0x4a9   :  { %v2545_v44 = vpop.f32.mrb[20].mxu1  ;;  %v3111_v47 = vpop.f32.mrb[22].mxu0 }
 0x4aa   :  { %v2546_v55 = vadd.f32 %v2545_v44, %v2454_v14  ;;  %v6309_v60 = vpop.f32.mrb[21].mxu1  ;;  %v6386_v2 = vpop.f32.mrb[23].mxu0 }
 0x4b1   :  { %v2625_v7 = vpop.f32.mrb[22].mxu1  ;;  %v3271_v10 = vpop.f32.mrb[24].mxu0 }
 0x4b2   :  { %v2626_v16 = vadd.f32 %v2625_v7, %v2546_v55  ;;  %v6320_v19 = vpop.f32.mrb[23].mxu1  ;;  %v6408_v20 = vpop.f32.mrb[25].mxu0  ;;  %v8624_v55 = vld [vmem:[#allocation3_spill] sm:$0xff] }
 0x4b9   :  { %v2702_v22 = vpop.f32.mrb[24].mxu1 }
 0x4ba   :  { %v2703_v13 = vadd.f32 %v2702_v22, %v2626_v16  ;;  %v6331_v59 = vpop.f32.mrb[25].mxu1 }
 0x4c1   :  { %v2785_v33 = vpop.f32.mrb[26].mxu1 }
 0x4c2   :  { %v2786_v35 = vadd.f32 %v2785_v33, %v2703_v13  ;;  %v6342_v26 = vpop.f32.mrb[27].mxu1 }
 0x4c9   :  { %v2860_v52 = vpop.f32.mrb[28].mxu1 }
 0x4ca   :  { %v2861_v25 = vadd.f32 %v2860_v52, %v2786_v35  ;;  %v6353_v24 = vpop.f32.mrb[29].mxu1 }
 0x4cc   :  { %v2864_v51 = vadd.f32 %v2861_v25, %v7789_v38 }
 0x4d1   :  { %v3031_v18 = vpop.f32.mrb[30].mxu1 }
 0x4d2   :  { %v3032_v15 = vadd.f32 %v3031_v18, %v2940_v21  ;;  %v6375_v54 = vpop.f32.mrb[31].mxu1 }
 0x4d4   :  { %v3112_v11 = vadd.f32 %v3111_v47, %v3032_v15 }
 0x4d9   :  { %v3188_v8 = vpop.f32.mrb[32].mxu1 }
 0x4da   :  { %v3189_v1 = vadd.f32 %v3188_v8, %v3112_v11  ;;  %v6397_v12 = vpop.f32.mrb[33].mxu1 }
 0x4dc   :  { %v3272_v46 = vadd.f32 %v3271_v10, %v3189_v1 }
 0x4e1   :  { %v3346_v6 = vpop.f32.mrb[34].mxu1 }
 0x4e2   :  { %v3347_v45 = vadd.f32 %v3346_v6, %v3272_v46  ;;  %v6419_v17 = vpop.f32.mrb[35].mxu1 }
 0x4e4   :  { %v3350_v50 = vadd.f32 %v3347_v45, %v7791_v29 }
 0x4e6   :  { %v3371_v58 = vrot.slane %v3350_v50, %v7741_v30  ;;  %v3354_v14 = vrot.slane %v3350_v50, %v7733_v27  ;;  %v3405_v37 = vrot.slane %v3350_v50, %v7748_v42  ;;  %v3388_v21 = vrot.slane %v3350_v50, %v7736_v28 }
 0x4e7   :  { %v3422_v44 = vrot.slane %v3350_v50, %v8623_v41  ;;  %v3456_v47 = vrot.slane %v3350_v50, %v7794_v62  ;;  %v3439_v60 = vrot.slane %v3350_v50, %v8624_v55  ;;  %v3473_v2 = vrot.slane %v3350_v50, %v7797_v43 }
 0x4e8   :  { %v3372_v7 = vadd.f32 %v3371_v58, %v2864_v51  ;;  %v3355_v29 = vadd.f32 %v3354_v14, %v2864_v51  ;;  %v3406_v10 = vadd.f32 %v3405_v37, %v2864_v51  ;;  %v3389_v38 = vadd.f32 %v3388_v21, %v2864_v51 }
 0x4e9   :  { %v3423_v16 = vadd.f32 %v3422_v44, %v2864_v51  ;;  %v3457_v30 = vadd.f32 %v3456_v47, %v2864_v51  ;;  %v3440_v19 = vadd.f32 %v3439_v60, %v2864_v51  ;;  %v3474_v27 = vadd.f32 %v3473_v2, %v2864_v51 }
 0x4ea   :  { %v3373_v20 = vmax.f32 %v3372_v7, 0.0  ;;  %v3356_v42 = vmax.f32 %v3355_v29, 0.0  ;;  %v8113_v22 = vmax.f32 %v3406_v10, 0.0  ;;  %v3390_v28 = vmax.f32 %v3389_v38, 0.0 }
 0x4eb   :  { %v8115_v13 = vmax.f32 %v3423_v16, 0.0  ;;  %v8119_v35 = vmax.f32 %v3440_v19, 0.0  ;;  %v3458_v18 = vmax.f32 %v3457_v30, 0.0  ;;  %v3475_v11 = vmax.f32 %v3474_v27, 0.0 }
 0x4ec   :  { %v3374_v62 = vmul.f32 %v3373_v20, %v3373_v20  ;;  %v3357_v59 = vmul.f32 %v3356_v42, %v3356_v42  ;;  %v3408_v43 = vmul.f32 %v8113_v22, %v8113_v22  ;;  %v3391_v33 = vmul.f32 %v3390_v28, %v3390_v28 }
 0x4ed   :  { %v3425_v24 = vmul.f32 %v8115_v13, %v8115_v13  ;;  %v3442_v54 = vmul.f32 %v8119_v35, %v8119_v35  ;;  %v3459_v1 = vmul.f32 %v3458_v18, %v3458_v18  ;;  %v3476_v46 = vmul.f32 %v3475_v11, %v3475_v11 }
 0x4ee   :  { %v3375_v26 = vadd.f32 0.01, %v3374_v62  ;;  %v3358_v52 = vadd.f32 0.01, %v3357_v59  ;;  %v3392_v25 = vadd.f32 0.01, %v3391_v33 }
 0x4ef   :  { %v3409_v15 = vadd.f32 0.01, %v3408_v43  ;;  %v3426_v8 = vadd.f32 0.01, %v3425_v24  ;;  %v3443_v12 = vadd.f32 0.01, %v3442_v54 }
 0x4f0   :  { %7380 = vrcp.f32 %v3375_v26  ;;  %v3460_v6 = vadd.f32 0.01, %v3459_v1  ;;  %v3477_v45 = vadd.f32 0.01, %v3476_v46 }
 0x4f1   :  { %7382 = vrcp.f32 %v3358_v52 }
 0x4f2   :  { %7384 = vrcp.f32 %v3392_v25 }
 0x4f3   :  { %7386 = vrcp.f32 %v3409_v15 }
 0x4f4   :  { %7388 = vrcp.f32 %v3426_v8 }
 0x4f5   :  { %7390 = vrcp.f32 %v3443_v12 }
 0x4f6   :  { %7392 = vrcp.f32 %v3460_v6 }
 0x4f7   :  { %7394 = vrcp.f32 %v3477_v45 }
 0x4fa   :  { %v7381_v17 = vpop.eup %7380 }
 0x4fb   :  { %v7383_v50 = vpop.eup %7382  ;;  %3379 = vrot.lane.b32.xlu0 %v7381_v17, %s7407_s6 }
 0x4fc   :  { %3362 = vrot.lane.b32.xlu1 %v7383_v50, %s7407_s6  ;;  %v3384_v51 = vadd.f32 %v7383_v50, %v7381_v17  ;;  %v7385_v58 = vpop.eup %7384 }
 0x4fd   :  { %v7387_v14 = vpop.eup %7386 }
 0x4fe   :  { %v3401_v37 = vadd.f32 %v7385_v58, %v3384_v51  ;;  %v7389_v41 = vpop.eup %7388 }
 0x4ff   :  { %3413 = vrot.lane.b32.xlu0 %v7387_v14, %s7407_s6  ;;  %v7391_v47 = vpop.eup %7390 }
 0x500   :  { %3396 = vrot.lane.b32.xlu1 %v7385_v58, %s7407_s6  ;;  %v3418_v21 = vadd.f32 %v7387_v14, %v3401_v37  ;;  %v7393_v60 = vpop.eup %7392 }
 0x501   :  { %v7395_v7 = vpop.eup %7394 }
 0x502   :  { %v3435_v44 = vadd.f32 %v7389_v41, %v3418_v21 }
 0x503   :  { %3430 = vrot.lane.b32.xlu0 %v7389_v41, %s7407_s6 }
 0x504   :  { %v3452_v55 = vadd.f32 %v7391_v47, %v3435_v44 }
 0x506   :  { %v3469_v2 = vadd.f32 %v7393_v60, %v3452_v55 }
 0x507   :  { %3464 = vrot.lane.b32.xlu0 %v7393_v60, %s7407_s6 }
 0x508   :  { %v3486_v29 = vadd.f32 %v7395_v7, %v3469_v2 }
 0x50a   :  { %3488 = vrot.lane.b32.xlu1 %v3486_v29, %s7407_s6 }
 0x50e   :  { %3447 = vrot.lane.b32.xlu1 %v7391_v47, %s7407_s6 }
 0x512   :  { %3481 = vrot.lane.b32.xlu1 %v7395_v7, %s7407_s6 }
 0x56d   :  { %v3380_v10 = vpop.permute.xlu0 %3379 }
 0x56e   :  { %v3363_v38 = vpop.permute.xlu1 %3362  ;;  %v3382_v30 = vmul.f32 %v3380_v10, %v3373_v20 }
 0x56f   :  { %v3365_v19 = vmul.f32 %v3363_v38, %v3356_v42 }
 0x571   :  { %v3414_v27 = vpop.permute.xlu0 %3413  ;;  %v3383_v59 = vadd.f32 %v3382_v30, %v3365_v19 }
 0x572   :  { %v3397_v16 = vpop.permute.xlu1 %3396  ;;  %v3416_v26 = vmul.f32 %v3414_v27, %v8113_v22 }
 0x573   :  { %v3399_v62 = vmul.f32 %v3397_v16, %v3390_v28 }
 0x575   :  { %v3400_v43 = vadd.f32 %v3399_v62, %v3383_v59  ;;  %v3431_v33 = vpop.permute.xlu0 %3430 }
 0x576   :  { %v3433_v24 = vmul.f32 %v3431_v33, %v8115_v13 }
 0x577   :  { %v3417_v25 = vadd.f32 %v3416_v26, %v3400_v43 }
 0x579   :  { %v3465_v15 = vpop.permute.xlu0 %3464  ;;  %v3434_v8 = vadd.f32 %v3433_v24, %v3417_v25 }
 0x57a   :  { %v3467_v12 = vmul.f32 %v3465_v15, %v3458_v18 }
 0x57c   :  { %v3489_v52 = vpop.permute.xlu1 %3488 }
 0x57d   :  { %7396 = vrcp.f32 %v3489_v52 }
 0x580   :  { %v3448_v54 = vpop.permute.xlu1 %3447 }
 0x581   :  { %v3450_v1 = vmul.f32 %v3448_v54, %v8119_v35 }
 0x583   :  { %v3451_v20 = vadd.f32 %v3450_v1, %v3434_v8 }
 0x584   :  { %v3482_v42 = vpop.permute.xlu1 %3481 }
 0x585   :  { %v3468_v46 = vadd.f32 %v3467_v12, %v3451_v20  ;;  %v3484_v28 = vmul.f32 %v3482_v42, %v3475_v11 }
 0x587   :  { %v7397_v6 = vpop.eup %7396  ;;  %v3485_v45 = vadd.f32 %v3484_v28, %v3468_v46 }
 0x589   :  { %v3492_v17 = vmul.f32 %v7397_v6, %v3485_v45 }
 0x58b   :  { %v3493_v22 = vadd.f32 %v8018_v63, %v3492_v17 }
 0x58d   :  { %v3495_v50 = vsel %vm264_vm0, %v3493_v22, 0 }
 0x58e   :  { %v3566_v51 = vand.u32 4294901760, %v3495_v50 }
 0x590   :  { %v3567_v13 = vsub.f32 %v3495_v50, %v3566_v51  ;;  %6440 = vmatmul.mubr.f32.vlgmr.msra.gmra.mrb[36].mxu1 %v3566_v51 }
 0x591   :  { %7064 = vmatpush3.bf16.msra.mxu1 %v7863_v0  ;;  %6461 = vmatprep.mubr.msk.f32.mxu1 %vm7399_vm1, %v8622_v56 }
 0x592   :  { %7065 = vmatprep.subr.bf16.mxu1 %v8620_v36  ;;  %v3568_v35 = vand.u32 4294901760, %v3567_v13 }
 0x594   :  { %v3569_v18 = vsub.f32 %v3567_v13, %v3568_v35 }
 0x595   :  { %7067 = vmatpush3.bf16.msra.mxu1 %v7876_v34 }
 0x596   :  { %7074 = vmatprep.subr.bf16.mxu1 %v8620_v36  ;;  %v3570_v11 = vand.u32 4294901760, %v3569_v18  ;;  %v4975_v18 = vld [vmem:[%s8603_s13 + $0x10] sm:$0xff] }
 0x598   :  { %6462 = vmatmul.mubr.f32.vlgmr.msra.gmra.mrb[38].mxu1 %v3568_v35  ;;  %6429 = vmatmul.mubr.f32.vlgmr.msra.gmra.mrb[26].mxu0 %v3570_v11  ;;  %v4974_v35 = vld [vmem:[%s8603_s13 + $0x8] sm:$0xff] }
 0x599   :  { %7058 = vmatpush3.bf16.msra.mxu0 %v7882_v53  ;;  %7076 = vmatpush3.bf16.msra.mxu1 %v7863_v0 }
 0x59a   :  { %7059 = vmatprep.subr.bf16.mxu0 %v8620_v36  ;;  %7077 = vmatprep.subr.bf16.mxu1 %v8620_v36 }
 0x59b   :  { %6450 = vmatprep.mubr.msk.f32.mxu0 %vm7399_vm1, %v8622_v56  ;;  %6483 = vmatprep.mubr.msk.f32.mxu1 %vm7399_vm1, %v8622_v56 }
 0x59d   :  { %7061 = vmatpush3.bf16.msra.mxu0 %v7884_v40  ;;  %7079 = vmatpush3.bf16.msra.mxu1 %v7876_v34 }
 0x59e   :  { %7068 = vmatprep.subr.bf16.mxu0 %v8620_v36  ;;  %7116 = vmatprep.subr.bf16.mxu1 %v8620_v36 }
 0x5a0   :  { %6451 = vmatmul.mubr.f32.vlgmr.msra.gmra.mrb[28].mxu0 %v3567_v13  ;;  %6484 = vmatmul.mubr.f32.vlgmr.msra.gmra.mrb[40].mxu1 %v3566_v51  ;;  %v4973_v13 = vld [vmem:[%s8603_s13] sm:$0xff] }
 0x5a1   :  { %7070 = vmatpush3.bf16.msra.mxu0 %v7886_v57  ;;  %6472 = vmatprep.mubr.msk.f32.mxu0 %vm7399_vm1, %v8622_v56  ;;  %v4997_v11 = vand.u32 4294901760, %v4973_v13 }
 0x5a2   :  { %7071 = vmatprep.subr.bf16.mxu0 %v8620_v36  ;;  %6560 = vmatprep.mubr.msk.f32.mxu1 %vm7399_vm1, %v8622_v56 }
 0x5a5   :  { %7073 = vmatpush3.bf16.msra.mxu0 %v7888_v5 }
 0x5a6   :  { %7080 = vmatprep.subr.bf16.mxu0 %v8620_v36 }
 0x5a8   :  { %6473 = vmatmul.mubr.f32.vlgmr.msra.gmra.mrb[30].mxu0 %v3566_v51 }
 0x5a9   :  { %7082 = vmatpush3.bf16.msra.mxu0 %v7944_v32  ;;  %6494 = vmatprep.mubr.msk.f32.mxu0 %vm7399_vm1, %v8622_v56 }
 0x5aa   :  { %7083 = vmatprep.subr.bf16.mxu0 %v8620_v36 }
 0x5ad   :  { %7085 = vmatpush3.bf16.msra.mxu0 %v7947_v39 }
 0x5ae   :  { %7086 = vmatprep.subr.bf16.mxu0 %v8620_v36 }
 0x663   :  { %v3663_v0 = vpop.f32.mrb[36].mxu1 }
 0x664   :  { %v6441_v34 = vpop.f32.mrb[37].mxu1 }
 0x665   :  { %v4976_v34 = vld [vmem:[%s8603_s13 + $0x18] sm:$0xff] }
 0x66b   :  { %v3820_v53 = vpop.f32.mrb[38].mxu1  ;;  %v3572_v40 = vpop.f32.mrb[26].mxu0 }
 0x66c   :  { %v3664_v57 = vadd.f32 %v3663_v0, %v3572_v40  ;;  %v6463_v5 = vpop.f32.mrb[39].mxu1  ;;  %v6430_v63 = vpop.f32.mrb[27].mxu0  ;;  %v5000_v0 = vand.u32 4294901760, %v4974_v35  ;;  %v5006_v40 = vand.u32 4294901760, %v4976_v34 }
 0x66d   :  { %v8267_v5 = vsub.f32 %v4973_v13, %v4997_v11 }
 0x66e   :  { %v8269_v63 = vsub.f32 %v4974_v35, %v5000_v0 }
 0x673   :  { %v3743_v58 = vpop.f32.mrb[28].mxu0  ;;  %v3978_v14 = vpop.f32.mrb[40].mxu1 }
 0x674   :  { %v3744_v37 = vadd.f32 %v3743_v58, %v3664_v57  ;;  %v6452_v21 = vpop.f32.mrb[29].mxu0  ;;  %v6485_v41 = vpop.f32.mrb[41].mxu1  ;;  %v8265_v57 = vpack.c.bf16 %v5000_v0, %v4997_v11  ;;  %v5090_v11 = vand.u32 4294901760, %v8267_v5  ;;  %v5097_v0 = vand.u32 4294901760, %v8269_v63 }
 0x675   :  { %v4978_v21 = vld [vmem:[%s8603_s13 + $0x28] sm:$0xff] }
 0x676   :  { %v3821_v44 = vadd.f32 %v3820_v53, %v3744_v37  ;;  %v5003_v53 = vand.u32 4294901760, %v4975_v18  ;;  %v4977_v37 = vld [vmem:[%s8603_s13 + $0x20] sm:$0xff] }
 0x678   :  { %v8271_v58 = vsub.f32 %v4975_v18, %v5003_v53  ;;  %v8282_v41 = vpack.c.bf16 %v5006_v40, %v5003_v53  ;;  %v5091_v53 = vsub.f32 %v8267_v5, %v5090_v11 }
 0x67b   :  { %v3903_v47 = vpop.f32.mrb[30].mxu0 }
 0x67c   :  { %v3904_v55 = vadd.f32 %v3903_v47, %v3821_v44  ;;  %v6474_v60 = vpop.f32.mrb[31].mxu0  ;;  %v5009_v44 = vand.u32 4294901760, %v4977_v37  ;;  %v5012_v47 = vand.u32 4294901760, %v4978_v21 }
 0x67e   :  { %v3979_v2 = vadd.f32 %v3978_v14, %v3904_v55  ;;  %v8273_v14 = vsub.f32 %v4976_v34, %v5006_v40  ;;  %v8285_v55 = vsub.f32 %v4977_v37, %v5009_v44  ;;  %v8287_v60 = vsub.f32 %v4978_v21, %v5012_v47 }
 0x67f   :  { %v8425_v34 = vpack.c.bf16 %v5097_v0, %v5090_v11  ;;  %v5098_v40 = vsub.f32 %v8269_v63, %v5097_v0  ;;  %v5092_v37 = vand.u32 4294901760, %v5091_v53 }
 0x680   :  { %v3982_v7 = vadd.f32 %v3979_v2, %v7972_v61  ;;  %v4979_v2 = vld [vmem:[%s8603_s13 + $0x30] sm:$0xff] }
 0x681   :  { %v5099_v21 = vand.u32 4294901760, %v5098_v40 }
 0x682   :  { %v3983_v29 = vmax.f32 %v3982_v7, 0.0  ;;  %v4980_v7 = vld [vmem:[%s8603_s13 + $0x38] sm:$0xff] }
 0x684   :  { %v3985_v10 = vsel %vm264_vm0, %v3983_v29, 0  ;;  %v8296_v29 = vpack.c.bf16 %v5012_v47, %v5009_v44  ;;  %v5104_v44 = vand.u32 4294901760, %v8271_v58  ;;  %v5111_v47 = vand.u32 4294901760, %v8273_v14 }
 0x685   :  { %v4056_v38 = vand.u32 4294901760, %v3985_v10 }
 0x687   :  { %v4057_v16 = vsub.f32 %v3985_v10, %v4056_v38  ;;  %v5015_v10 = vand.u32 4294901760, %v4979_v2 }
 0x689   :  { %v4058_v30 = vand.u32 4294901760, %v4057_v16 }
 0x68b   :  { %v4059_v19 = vsub.f32 %v4057_v16, %v4058_v30 }
 0x68d   :  { %v4060_v27 = vand.u32 4294901760, %v4059_v19  ;;  %v4981_v19 = vld [vmem:[%s8603_s13 + $0x40] sm:$0xff] }
 0x68f   :  { %6495 = vmatmul.mubr.f32.vlgmr.msra.gmra.mrb[32].mxu0 %v4060_v27  ;;  %v4982_v27 = vld [vmem:[%s8603_s13 + $0x48] sm:$0xff] }
 0x690   :  { %7088 = vmatpush3.bf16.msra.mxu0 %v7952_v23  ;;  %6505 = vmatprep.mubr.msk.f32.mxu0 %vm7399_vm1, %v8622_v56  ;;  %v4473_v23 = vld [vmem:[%s8602_s11] sm:$0xff] }
 0x691   :  { %7089 = vmatprep.subr.bf16.mxu0 %v8620_v36 }
 0x694   :  { %7091 = vmatpush3.bf16.msra.mxu0 %v7954_v48  ;;  %v4488_v48 = vand.u32 4294901760, %v4473_v23 }
 0x695   :  { %7092 = vmatprep.subr.bf16.mxu0 %v8620_v36 }
 0x696   :  { %v8219_v62 = vsub.f32 %v4473_v23, %v4488_v48 }
 0x697   :  { %6506 = vmatmul.mubr.f32.vlgmr.msra.gmra.mrb[32].mxu0 %v4056_v38 }
 0x698   :  { %7094 = vmatpush3.bf16.msra.mxu0 %v7956_v9  ;;  %6516 = vmatprep.mubr.msk.f32.mxu0 %vm7399_vm1, %v8622_v56  ;;  %v4569_v52 = vand.u32 4294901760, %v8219_v62 }
 0x699   :  { %7095 = vmatprep.subr.bf16.mxu0 %v8620_v36 }
 0x69a   :  { %v4570_v24 = vsub.f32 %v8219_v62, %v4569_v52 }
 0x69c   :  { %7097 = vmatpush3.bf16.msra.mxu0 %v7958_v31  ;;  %v4476_v31 = vld [vmem:[%s8602_s11 + $0x18] sm:$0xff]  ;;  %v4571_v54 = vand.u32 4294901760, %v4570_v24 }
 0x69d   :  { %7098 = vmatprep.subr.bf16.mxu0 %v8620_v36 }
 0x69f   :  { %6517 = vmatmul.mubr.f32.vlgmr.msra.gmra.mrb[32].mxu0 %v4057_v16  ;;  %v8299_v16 = vsub.f32 %v4979_v2, %v5015_v10  ;;  %v8431_v2 = vpack.c.bf16 %v5099_v21, %v5092_v37 }
 0x6a0   :  { %7100 = vmatpush3.bf16.msra.mxu0 %v7944_v32  ;;  %6527 = vmatprep.mubr.msk.f32.mxu0 %vm7399_vm1, %v8622_v56 }
 0x6a1   :  { %7101 = vmatprep.subr.bf16.mxu0 %v8620_v36 }
 0x6a4   :  { %7103 = vmatpush3.bf16.msra.mxu0 %v7947_v39 }
 0x6a5   :  { %7104 = vmatprep.subr.bf16.mxu0 %v8620_v36 }
 0x6a7   :  { %6528 = vmatmul.mubr.f32.vlgmr.msra.gmra.mrb[32].mxu0 %v4058_v30 }
 0x6a8   :  { %7106 = vmatpush3.bf16.msra.mxu0 %v7960_v49  ;;  %6538 = vmatprep.mubr.msk.f32.mxu0 %vm7399_vm1, %v8622_v56 }
 0x6a9   :  { %7107 = vmatprep.subr.bf16.mxu0 %v8620_v36 }
 0x6ac   :  { %7109 = vmatpush3.bf16.msra.mxu0 %v7962_v3  ;;  %v4497_v3 = vand.u32 4294901760, %v4476_v31 }
 0x6ad   :  { %7110 = vmatprep.subr.bf16.mxu0 %v8620_v36 }
 0x6ae   :  { %v8225_v33 = vsub.f32 %v4476_v31, %v4497_v3  ;;  %v4983_v31 = vld [vmem:[%s8603_s13 + $0x50] sm:$0xff] }
 0x6af   :  { %6539 = vmatmul.mubr.f32.vlgmr.msra.gmra.mrb[32].mxu0 %v4056_v38 }
 0x6b0   :  { %7112 = vmatpush3.bf16.msra.mxu0 %v7944_v32  ;;  %6549 = vmatprep.mubr.msk.f32.mxu0 %vm7399_vm1, %v8622_v56  ;;  %v4474_v32 = vld [vmem:[%s8602_s11 + $0x8] sm:$0xff]  ;;  %v4590_v12 = vand.u32 4294901760, %v8225_v33 }
 0x6b1   :  { %7113 = vmatprep.subr.bf16.mxu0 %v8620_v36  ;;  %v4491_v9 = vand.u32 4294901760, %v4474_v32 }
 0x6b2   :  { %v4591_v46 = vsub.f32 %v8225_v33, %v4590_v12 }
 0x6b3   :  { %v8217_v61 = vpack.c.bf16 %v4491_v9, %v4488_v48  ;;  %v8221_v59 = vsub.f32 %v4474_v32, %v4491_v9  ;;  %v5021_v32 = vand.u32 4294901760, %v4981_v19  ;;  %v5024_v48 = vand.u32 4294901760, %v4982_v27 }
 0x6b4   :  { %7115 = vmatpush3.bf16.msra.mxu0 %v7947_v39  ;;  %v4475_v39 = vld [vmem:[%s8602_s11 + $0x10] sm:$0xff]  ;;  %v4592_v6 = vand.u32 4294901760, %v4591_v46 }
 0x6b5   :  { %7224 = vmatprep.subr.bf16.mxu0 %v8620_v36  ;;  %v4494_v49 = vand.u32 4294901760, %v4475_v39  ;;  %7118 = vmatpush3.bf16.msra.mxu1 %v8217_v61  ;;  %v4576_v25 = vand.u32 4294901760, %v8221_v59  ;;  %v7129_v17 = vpack.c.bf16 %v8221_v59, %v8219_v62  ;;  %v8313_v9 = vsub.f32 %v4981_v19, %v5021_v32 }
 0x6b6   :  { %7119 = vmatprep.subr.bf16.mxu1 %v8620_v36 }
 0x6b7   :  { %6550 = vmatmul.mubr.f32.vlgmr.msra.gmra.mrb[32].mxu0 %v4056_v38  ;;  %v8223_v43 = vsub.f32 %v4475_v39, %v4494_v49  ;;  %v8228_v26 = vpack.c.bf16 %v4497_v3, %v4494_v49  ;;  %v4577_v15 = vsub.f32 %v8221_v59, %v4576_v25  ;;  %v8249_v50 = vpack.c.bf16 %v4576_v25, %v4569_v52  ;;  %v4984_v49 = vld [vmem:[%s8603_s13 + $0x58] sm:$0xff] }
 0x6b8   :  { %6755 = vmatprep.mubr.msk.f32.mxu0 %vm7399_vm1, %v8622_v56  ;;  %7226 = vmatpush3.bf16.msra.mxu0 %v8265_v57  ;;  %v5018_v38 = vand.u32 4294901760, %v4980_v7  ;;  %v8315_v39 = vsub.f32 %v4982_v27, %v5024_v48  ;;  %v8324_v3 = vpack.c.bf16 %v5024_v48, %v5021_v32  ;;  %v5027_v52 = vand.u32 4294901760, %v4983_v31 }
 0x6b9   :  { %7121 = vmatpush3.bf16.msra.mxu1 %v8228_v26  ;;  %v4578_v8 = vand.u32 4294901760, %v4577_v15  ;;  %v4583_v1 = vand.u32 4294901760, %v8223_v43  ;;  %v7132_v22 = vpack.c.bf16 %v8225_v33, %v8223_v43  ;;  %7227 = vmatprep.subr.bf16.mxu0 %v8620_v36  ;;  %v5030_v25 = vand.u32 4294901760, %v4984_v49  ;;  %v4987_v33 = vld [vmem:[%s8603_s13 + $0x70] sm:$0xff] }
 0x6ba   :  { %7122 = vmatprep.subr.bf16.mxu1 %v8620_v36  ;;  %v8301_v30 = vsub.f32 %v4980_v7, %v5018_v38  ;;  %v8310_v23 = vpack.c.bf16 %v5018_v38, %v5015_v10  ;;  %v8327_v24 = vsub.f32 %v4983_v31, %v5027_v52  ;;  %v8433_v7 = vpack.c.bf16 %v5111_v47, %v5104_v44 }
 0x6bb   :  { %v8239_v20 = vpack.c.bf16 %v4578_v8, %v4571_v54  ;;  %v4584_v42 = vsub.f32 %v8223_v43, %v4583_v1  ;;  %v8251_v51 = vpack.c.bf16 %v4590_v12, %v4583_v1  ;;  %v8329_v15 = vsub.f32 %v4984_v49, %v5030_v25 }
 0x6bc   :  { %7229 = vmatpush3.bf16.msra.mxu0 %v8282_v41  ;;  %v8332_v54 = vpack.c.bf16 %v5030_v25, %v5027_v52  ;;  %v5105_v10 = vsub.f32 %v8271_v58, %v5104_v44  ;;  %v5112_v38 = vsub.f32 %v8273_v14, %v5111_v47  ;;  %v5118_v32 = vand.u32 4294901760, %v8285_v55 }
 0x6bd   :  { %v4585_v28 = vand.u32 4294901760, %v4584_v42  ;;  %7230 = vmatprep.subr.bf16.mxu0 %v8620_v36  ;;  %v5125_v48 = vand.u32 4294901760, %v8287_v60  ;;  %v5160_v0 = vand.u32 4294901760, %v8327_v24  ;;  %v5167_v53 = vand.u32 4294901760, %v8329_v15 }
 0x6be   :  { %v5106_v19 = vand.u32 4294901760, %v5105_v10  ;;  %v5113_v27 = vand.u32 4294901760, %v5112_v38  ;;  %v5119_v52 = vsub.f32 %v8285_v55, %v5118_v32 }
 0x6bf   :  { %v8243_v45 = vpack.c.bf16 %v4592_v6, %v4585_v28  ;;  %v8441_v49 = vpack.c.bf16 %v5125_v48, %v5118_v32  ;;  %v5126_v25 = vsub.f32 %v8287_v60, %v5125_v48  ;;  %v8465_v37 = vpack.c.bf16 %v5167_v53, %v5160_v0 }
 0x6c0   :  { %7232 = vmatpush3.bf16.msra.mxu0 %v8296_v29  ;;  %v8439_v31 = vpack.c.bf16 %v5113_v27, %v5106_v19  ;;  %v5161_v21 = vsub.f32 %v8327_v24, %v5160_v0  ;;  %v5168_v44 = vsub.f32 %v8329_v15, %v5167_v53  ;;  %v7213_v0 = vpack.c.bf16 %v8315_v39, %v8313_v9 }
 0x6c1   :  { %7233 = vmatprep.subr.bf16.mxu0 %v8620_v36  ;;  %v7216_v53 = vpack.c.bf16 %v8329_v15, %v8327_v24 }
 0x6c2   :  { %v5162_v47 = vand.u32 4294901760, %v5161_v21  ;;  %v5169_v10 = vand.u32 4294901760, %v5168_v44 }
 0x6c4   :  { %7235 = vmatpush3.bf16.msra.mxu0 %v8310_v23  ;;  %v7192_v27 = vpack.c.bf16 %v5169_v10, %v5162_v47 }
 0x6c5   :  { %7236 = vmatprep.subr.bf16.mxu0 %v8620_v36 }
 0x6c8   :  { %7238 = vmatpush3.bf16.msra.mxu0 %v8324_v3 }
 0x6c9   :  { %7239 = vmatprep.subr.bf16.mxu0 %v8620_v36 }
 0x6cc   :  { %7241 = vmatpush3.bf16.msra.mxu0 %v8332_v54 }
 0x6cd   :  { %7242 = vmatprep.subr.bf16.mxu0 %v8620_v36 }
 0x78a   :  { %v4468_v8 = vpop.f32.mrb[32].mxu0 }
 0x78b   :  { %v7297_v1 = vadd.f32 %v8015_v4, %v4468_v8  ;;  %v6551_v12 = vpop.f32.mrb[33].mxu0  ;;  %v4985_v4 = vld [vmem:[%s8603_s13 + $0x60] sm:$0xff]  ;;  %v5120_v8 = vand.u32 4294901760, %v5119_v52 }
 0x78c   :  { %v5033_v62 = vand.u32 4294901760, %v4985_v4  ;;  %v5132_v12 = vand.u32 4294901760, %v8299_v16 }
 0x78d   :  { %4472 = vst.msk [vmem:[%s8604_s15] sm:$0xff] %vm264_vm0, %v7297_v1  ;;  %v4485_v42 = vsel %vm264_vm0, %v7297_v1, 0  ;;  %v5127_v1 = vand.u32 4294901760, %v5126_v25 }
 0x78e   :  { %v4556_v46 = vand.u32 4294901760, %v4485_v42 }
 0x790   :  { %v4557_v28 = vsub.f32 %v4485_v42, %v4556_v46  ;;  %v5139_v42 = vand.u32 4294901760, %v8301_v30 }
 0x792   :  { %v4558_v6 = vand.u32 4294901760, %v4557_v28 }
 0x794   :  { %v4559_v13 = vsub.f32 %v4557_v28, %v4558_v6 }
 0x796   :  { %v4560_v35 = vand.u32 4294901760, %v4559_v13  ;;  %v5140_v13 = vsub.f32 %v8301_v30, %v5139_v42 }
 0x798   :  { %6561 = vmatmul.mubr.f32.vlgmr.msra.gmra.mrb[42].mxu1 %v4560_v35 }
 0x799   :  { %7124 = vmatpush3.bf16.msra.mxu1 %v8239_v20  ;;  %6571 = vmatprep.mubr.msk.f32.mxu1 %vm7399_vm1, %v8622_v56  ;;  %v5039_v20 = vand.u32 4294901760, %v4987_v33 }
 0x79a   :  { %7125 = vmatprep.subr.bf16.mxu1 %v8620_v36 }
 0x79d   :  { %7127 = vmatpush3.bf16.msra.mxu1 %v8243_v45 }
 0x79e   :  { %7128 = vmatprep.subr.bf16.mxu1 %v8620_v36 }
 0x7a0   :  { %6572 = vmatmul.mubr.f32.vlgmr.msra.gmra.mrb[42].mxu1 %v4556_v46 }
 0x7a1   :  { %7130 = vmatpush3.bf16.msra.mxu1 %v7129_v17  ;;  %6582 = vmatprep.mubr.msk.f32.mxu1 %vm7399_vm1, %v8622_v56 }
 0x7a2   :  { %7131 = vmatprep.subr.bf16.mxu1 %v8620_v36 }
 0x7a5   :  { %7133 = vmatpush3.bf16.msra.mxu1 %v7132_v22  ;;  %v8411_v22 = vsub.f32 %v4985_v4, %v5033_v62  ;;  %v5141_v4 = vand.u32 4294901760, %v5140_v13 }
 0x7a6   :  { %7134 = vmatprep.subr.bf16.mxu1 %v8620_v36 }
 0x7a7   :  { %v5174_v38 = vand.u32 4294901760, %v8411_v22 }
 0x7a8   :  { %6583 = vmatmul.mubr.f32.vlgmr.msra.gmra.mrb[42].mxu1 %v4557_v28  ;;  %v8449_v28 = vpack.c.bf16 %v5139_v42, %v5132_v12 }
 0x7a9   :  { %7136 = vmatpush3.bf16.msra.mxu1 %v8217_v61  ;;  %6593 = vmatprep.mubr.msk.f32.mxu1 %vm7399_vm1, %v8622_v56  ;;  %v5175_v48 = vsub.f32 %v8411_v22, %v5174_v38 }
 0x7aa   :  { %7137 = vmatprep.subr.bf16.mxu1 %v8620_v36 }
 0x7ab   :  { %v5176_v25 = vand.u32 4294901760, %v5175_v48 }
 0x7ad   :  { %7139 = vmatpush3.bf16.msra.mxu1 %v8228_v26 }
 0x7ae   :  { %7140 = vmatprep.subr.bf16.mxu1 %v8620_v36 }
 0x7b0   :  { %6594 = vmatmul.mubr.f32.vlgmr.msra.gmra.mrb[42].mxu1 %v4558_v6  ;;  %v5133_v6 = vsub.f32 %v8299_v16, %v5132_v12 }
 0x7b1   :  { %7142 = vmatpush3.bf16.msra.mxu1 %v8249_v50  ;;  %6604 = vmatprep.mubr.msk.f32.mxu1 %vm7399_vm1, %v8622_v56 }
 0x7b2   :  { %7143 = vmatprep.subr.bf16.mxu1 %v8620_v36  ;;  %v5134_v35 = vand.u32 4294901760, %v5133_v6 }
 0x7b5   :  { %7145 = vmatpush3.bf16.msra.mxu1 %v8251_v51  ;;  %v8415_v51 = vsub.f32 %v4987_v33, %v5039_v20 }
 0x7b6   :  { %7146 = vmatprep.subr.bf16.mxu1 %v8620_v36 }
 0x7b8   :  { %6605 = vmatmul.mubr.f32.vlgmr.msra.gmra.mrb[42].mxu1 %v4556_v46 }
 0x7b9   :  { %7148 = vmatpush3.bf16.msra.mxu1 %v8217_v61  ;;  %6615 = vmatprep.mubr.msk.f32.mxu1 %vm7399_vm1, %v8622_v56  ;;  %v4986_v61 = vld [vmem:[%s8603_s13 + $0x68] sm:$0xff] }
 0x7ba   :  { %7149 = vmatprep.subr.bf16.mxu1 %v8620_v36  ;;  %v5036_v59 = vand.u32 4294901760, %v4986_v61 }
 0x7bc   :  { %v8397_v43 = vpack.c.bf16 %v5036_v59, %v5033_v62  ;;  %v8413_v50 = vsub.f32 %v4986_v61, %v5036_v59  ;;  %v5146_v61 = vand.u32 4294901760, %v8313_v9  ;;  %v5153_v62 = vand.u32 4294901760, %v8315_v39 }
 0x7bd   :  { %7151 = vmatpush3.bf16.msra.mxu1 %v8228_v26  ;;  %v4988_v26 = vld [vmem:[%s8603_s13 + $0x78] sm:$0xff]  ;;  %v8455_v59 = vpack.c.bf16 %v5141_v4, %v5134_v35 }
 0x7be   :  { %7152 = vmatprep.subr.bf16.mxu1 %v8620_v36  ;;  %7244 = vmatpush3.bf16.msra.mxu0 %v8397_v43  ;;  %v5042_v45 = vand.u32 4294901760, %v4988_v26  ;;  %v8457_v33 = vpack.c.bf16 %v5153_v62, %v5146_v61  ;;  %v5181_v19 = vand.u32 4294901760, %v8413_v50  ;;  %v7219_v21 = vpack.c.bf16 %v8413_v50, %v8411_v22 }
 0x7bf   :  { %7245 = vmatprep.subr.bf16.mxu0 %v8620_v36 }
 0x7c0   :  { %6616 = vmatmul.mubr.f32.vlgmr.msra.gmra.mrb[42].mxu1 %v4556_v46  ;;  %v8409_v17 = vpack.c.bf16 %v5042_v45, %v5039_v20  ;;  %v8417_v18 = vsub.f32 %v4988_v26, %v5042_v45  ;;  %v8447_v46 = vpack.c.bf16 %v5127_v1, %v5120_v8  ;;  %v5147_v26 = vsub.f32 %v8313_v9, %v5146_v61 }
 0x7c1   :  { %7154 = vmatpush3.bf16.msra.mxu1 %v8265_v57  ;;  %6650 = vmatprep.mubr.msk.f32.mxu1 %vm7399_vm1, %v8622_v56  ;;  %v5154_v20 = vsub.f32 %v8315_v39, %v5153_v62  ;;  %v7267_v32 = vpack.c.bf16 %v5181_v19, %v5174_v38  ;;  %v5182_v52 = vsub.f32 %v8413_v50, %v5181_v19  ;;  %v5188_v1 = vand.u32 4294901760, %v8415_v51 }
 0x7c2   :  { %7155 = vmatprep.subr.bf16.mxu1 %v8620_v36  ;;  %7247 = vmatpush3.bf16.msra.mxu0 %v8409_v17  ;;  %v5148_v45 = vand.u32 4294901760, %v5147_v26  ;;  %v5195_v12 = vand.u32 4294901760, %v8417_v18  ;;  %v7201_v26 = vpack.c.bf16 %v8269_v63, %v8267_v5  ;;  %v7222_v5 = vpack.c.bf16 %v8417_v18, %v8415_v51  ;;  %v5650_v63 = vld [vmem:[%s8605_s12] ss:$0 sm:$0xff] }
 0x7c3   :  { %7248 = vmatprep.subr.bf16.mxu0 %v8620_v36  ;;  %v5155_v11 = vand.u32 4294901760, %v5154_v20  ;;  %v5183_v8 = vand.u32 4294901760, %v5182_v52  ;;  %v5189_v13 = vsub.f32 %v8415_v51, %v5188_v1  ;;  %v7204_v20 = vpack.c.bf16 %v8273_v14, %v8271_v58  ;;  %v5651_v58 = vld [vmem:[%s8606_s14] ss:$0 sm:$0xff] }
 0x7c4   :  { %v7270_v6 = vpack.c.bf16 %v5195_v12, %v5188_v1  ;;  %v5196_v35 = vsub.f32 %v8417_v18, %v5195_v12 }
 0x7c5   :  { %7157 = vmatpush3.bf16.msra.mxu1 %v8282_v41  ;;  %v8463_v40 = vpack.c.bf16 %v5155_v11, %v5148_v45  ;;  %v7195_v42 = vpack.c.bf16 %v5183_v8, %v5176_v25  ;;  %v5190_v4 = vand.u32 4294901760, %v5189_v13  ;;  %v7207_v45 = vpack.c.bf16 %v8287_v60, %v8285_v55 }
 0x7c6   :  { %7158 = vmatprep.subr.bf16.mxu1 %v8620_v36  ;;  %v5197_v61 = vand.u32 4294901760, %v5196_v35  ;;  %v7210_v11 = vpack.c.bf16 %v8301_v30, %v8299_v16 }
 0x7c8   :  { %v7198_v62 = vpack.c.bf16 %v5197_v61, %v5190_v4 }
 0x7c9   :  { %7160 = vmatpush3.bf16.msra.mxu1 %v8296_v29 }
 0x7ca   :  { %7161 = vmatprep.subr.bf16.mxu1 %v8620_v36 }
 0x7cd   :  { %7163 = vmatpush3.bf16.msra.mxu1 %v8310_v23 }
 0x7ce   :  { %7164 = vmatprep.subr.bf16.mxu1 %v8620_v36 }
 0x7d1   :  { %7166 = vmatpush3.bf16.msra.mxu1 %v8324_v3 }
 0x7d2   :  { %7167 = vmatprep.subr.bf16.mxu1 %v8620_v36 }
 0x7d5   :  { %7169 = vmatpush3.bf16.msra.mxu1 %v8332_v54 }
 0x7d6   :  { %7170 = vmatprep.subr.bf16.mxu1 %v8620_v36 }
 0x7d9   :  { %7172 = vmatpush3.bf16.msra.mxu1 %v8397_v43 }
 0x7da   :  { %7173 = vmatprep.subr.bf16.mxu1 %v8620_v36 }
 0x7dd   :  { %7175 = vmatpush3.bf16.msra.mxu1 %v8409_v17 }
 0x7de   :  { %7176 = vmatprep.subr.bf16.mxu1 %v8620_v36 }
 0x893   :  { %v4968_v44 = vpop.f32.mrb[42].mxu1 }
 0x894   :  { %v7298_v47 = vadd.f32 %v5650_v63, %v4968_v44  ;;  %v6617_v10 = vpop.f32.mrb[43].mxu1 }
 0x896   :  { %v4972_v38 = vmax.f32 %v7298_v47, 0.0 }
 0x898   :  { %v8496_v19 = vand.u32 4294901760, %v4972_v38 }
 0x89a   :  { %v8499_v48 = vsub.f32 %v4972_v38, %v8496_v19 }
 0x89c   :  { %v5079_v52 = vand.u32 4294901760, %v8499_v48 }
 0x89e   :  { %v5080_v25 = vsub.f32 %v8499_v48, %v5079_v52  ;;  %6756 = vmatmul.mubr.f32.vlgmr.msra.gmra.mrb[34].mxu0 %v5079_v52 }
 0x89f   :  { %7250 = vmatpush3.bf16.msra.mxu0 %v8425_v34  ;;  %6790 = vmatprep.mubr.msk.f32.mxu0 %vm7399_vm1, %v8622_v56 }
 0x8a0   :  { %7251 = vmatprep.subr.bf16.mxu0 %v8620_v36  ;;  %v5081_v8 = vand.u32 4294901760, %v5080_v25 }
 0x8a2   :  { %6651 = vmatmul.mubr.f32.vlgmr.msra.gmra.mrb[44].mxu1 %v5081_v8 }
 0x8a3   :  { %7178 = vmatpush3.bf16.msra.mxu1 %v8431_v2  ;;  %7253 = vmatpush3.bf16.msra.mxu0 %v8433_v7 }
 0x8a4   :  { %7179 = vmatprep.subr.bf16.mxu1 %v8620_v36  ;;  %7254 = vmatprep.subr.bf16.mxu0 %v8620_v36 }
 0x8a5   :  { %6685 = vmatprep.mubr.msk.f32.mxu1 %vm7399_vm1, %v8622_v56 }
 0x8a7   :  { %7181 = vmatpush3.bf16.msra.mxu1 %v8439_v31  ;;  %7256 = vmatpush3.bf16.msra.mxu0 %v8441_v49 }
 0x8a8   :  { %7182 = vmatprep.subr.bf16.mxu1 %v8620_v36  ;;  %7257 = vmatprep.subr.bf16.mxu0 %v8620_v36 }
 0x8ab   :  { %7184 = vmatpush3.bf16.msra.mxu1 %v8447_v46  ;;  %7259 = vmatpush3.bf16.msra.mxu0 %v8449_v28 }
 0x8ac   :  { %7185 = vmatprep.subr.bf16.mxu1 %v8620_v36  ;;  %7260 = vmatprep.subr.bf16.mxu0 %v8620_v36 }
 0x8af   :  { %7187 = vmatpush3.bf16.msra.mxu1 %v8455_v59  ;;  %7262 = vmatpush3.bf16.msra.mxu0 %v8457_v33 }
 0x8b0   :  { %7188 = vmatprep.subr.bf16.mxu1 %v8620_v36  ;;  %7263 = vmatprep.subr.bf16.mxu0 %v8620_v36 }
 0x8b3   :  { %7190 = vmatpush3.bf16.msra.mxu1 %v8463_v40  ;;  %7265 = vmatpush3.bf16.msra.mxu0 %v8465_v37 }
 0x8b4   :  { %7191 = vmatprep.subr.bf16.mxu1 %v8620_v36  ;;  %7266 = vmatprep.subr.bf16.mxu0 %v8620_v36 }
 0x8b7   :  { %7193 = vmatpush3.bf16.msra.mxu1 %v7192_v27  ;;  %7268 = vmatpush3.bf16.msra.mxu0 %v7267_v32 }
 0x8b8   :  { %7194 = vmatprep.subr.bf16.mxu1 %v8620_v36  ;;  %7269 = vmatprep.subr.bf16.mxu0 %v8620_v36 }
 0x8bb   :  { %7196 = vmatpush3.bf16.msra.mxu1 %v7195_v42  ;;  %7271 = vmatpush3.bf16.msra.mxu0 %v7270_v6 }
 0x8bc   :  { %7197 = vmatprep.subr.bf16.mxu1 %v8620_v36  ;;  %7272 = vmatprep.subr.bf16.mxu0 %v8620_v36 }
 0x8be   :  { %6791 = vmatmul.mubr.f32.vlgmr.msra.gmra.mrb[34].mxu0 %v8496_v19 }
 0x8bf   :  { %7199 = vmatpush3.bf16.msra.mxu1 %v7198_v62  ;;  %7274 = vmatpush3.bf16.msra.mxu0 %v8265_v57 }
 0x8c0   :  { %7200 = vmatprep.subr.bf16.mxu1 %v8620_v36  ;;  %7275 = vmatprep.subr.bf16.mxu0 %v8620_v36 }
 0x8c1   :  { %6825 = vmatprep.mubr.msk.f32.mxu0 %vm7399_vm1, %v8622_v56 }
 0x8c2   :  { %6686 = vmatmul.mubr.f32.vlgmr.msra.gmra.mrb[44].mxu1 %v8496_v19 }
 0x8c3   :  { %7202 = vmatpush3.bf16.msra.mxu1 %v7201_v26  ;;  %7277 = vmatpush3.bf16.msra.mxu0 %v8282_v41 }
 0x8c4   :  { %7203 = vmatprep.subr.bf16.mxu1 %v8620_v36  ;;  %7278 = vmatprep.subr.bf16.mxu0 %v8620_v36 }
 0x8c5   :  { %6720 = vmatprep.mubr.msk.f32.mxu1 %vm7399_vm1, %v8622_v56 }
 0x8c7   :  { %7205 = vmatpush3.bf16.msra.mxu1 %v7204_v20  ;;  %7280 = vmatpush3.bf16.msra.mxu0 %v8296_v29 }
 0x8c8   :  { %7206 = vmatprep.subr.bf16.mxu1 %v8620_v36  ;;  %7281 = vmatprep.subr.bf16.mxu0 %v8620_v36 }
 0x8cb   :  { %7208 = vmatpush3.bf16.msra.mxu1 %v7207_v45  ;;  %7283 = vmatpush3.bf16.msra.mxu0 %v8310_v23 }
 0x8cc   :  { %7209 = vmatprep.subr.bf16.mxu1 %v8620_v36  ;;  %7284 = vmatprep.subr.bf16.mxu0 %v8620_v36 }
 0x8cf   :  { %7211 = vmatpush3.bf16.msra.mxu1 %v7210_v11  ;;  %7286 = vmatpush3.bf16.msra.mxu0 %v8324_v3 }
 0x8d0   :  { %7212 = vmatprep.subr.bf16.mxu1 %v8620_v36  ;;  %7287 = vmatprep.subr.bf16.mxu0 %v8620_v36 }
 0x8d3   :  { %7214 = vmatpush3.bf16.msra.mxu1 %v7213_v0  ;;  %7289 = vmatpush3.bf16.msra.mxu0 %v8332_v54 }
 0x8d4   :  { %7215 = vmatprep.subr.bf16.mxu1 %v8620_v36  ;;  %7290 = vmatprep.subr.bf16.mxu0 %v8620_v36 }
 0x8d7   :  { %7217 = vmatpush3.bf16.msra.mxu1 %v7216_v53  ;;  %7292 = vmatpush3.bf16.msra.mxu0 %v8397_v43 }
 0x8d8   :  { %7218 = vmatprep.subr.bf16.mxu1 %v8620_v36  ;;  %7293 = vmatprep.subr.bf16.mxu0 %v8620_v36 }
 0x8db   :  { %7220 = vmatpush3.bf16.msra.mxu1 %v7219_v21  ;;  %7295 = vmatpush3.bf16.msra.mxu0 %v8409_v17 }
 0x8dc   :  { %7221 = vmatprep.subr.bf16.mxu1 %v8620_v36 }
 0x8de   :  { %6826 = vmatmul.mubr.f32.vlgmr.msra.gmra.mrb[34].mxu0 %v8496_v19 }
 0x8df   :  { %7223 = vmatpush3.bf16.msra.mxu1 %v7222_v5 }
 0x8e2   :  { %6721 = vmatmul.mubr.f32.vlgmr.msra.gmra.mrb[44].mxu1 %v8499_v48 }
 0x9b1   :  { %v5633_v56 = vpop.f32.mrb[34].mxu0 }
 0x9b2   :  { %v6827_v57 = vpop.f32.mrb[35].mxu0 }
 0x9b5   :  { %v5338_v14 = vpop.f32.mrb[44].mxu1 }
 0x9b6   :  { %v7299_v41 = vadd.f32 %v5651_v58, %v5338_v14  ;;  %v6722_v55 = vpop.f32.mrb[45].mxu1 }
 0x9b8   :  { %v7300_v60 = vadd.f32 %v7299_v41, %v5633_v56 }
 0x9ba   :  { %5638 = vst.msk [vmem:[%s8607_s16] sm:$0xff] %vm5637_vm2, %v7300_v60 }

</bundles_post_ra>
